<compile_context>
chip_gen: v6e
topology: v6e:2x2x1
jax: 0.10.0
libtpu: 0.0.40
codegen_flags: <defaults>
</compile_context>

<pallas_src>
import functools

import jax
import jax.numpy as jnp
from jax.experimental import pallas as pl
from jax.experimental.pallas import tpu as pltpu


TOK = 128   # lane-dense padding of the 100-wide per-token feature dim


def _round_up(x, m):
    return (x + m - 1) // m * m


# ---------------------------------------------------------------------------
# Fused VAE kernel: the whole encoder -> decoder chain in one pallas_call.
# All refs are whole-array VMEM residents; grid is empty (runs once).
# ---------------------------------------------------------------------------
def _fused_vae_kernel(x_ref, w1_ref, b1_ref, w2_ref, b2_ref, w3_ref, b3_ref,
                      w4_ref, b4_ref, w5_ref, b5_ref, o_ref, h1_ref,
                      *, seq, dim_m):
    # ---- shrink_tokens: per position, (Bp, dim_m) @ (dim_m, TOK) + b1 ------
    w1 = w1_ref[...]
    b1 = b1_ref[...]
    for s in range(seq):                                   # static unroll
        xs = x_ref[:, s * dim_m:(s + 1) * dim_m]           # 128-aligned slice
        h1_ref[:, s * TOK:(s + 1) * TOK] = (
            jnp.dot(xs, w1, preferred_element_type=jnp.float32) + b1)

    h1 = h1_ref[...].astype(jnp.bfloat16)                  # (Bp, S*TOK)

    # ---- shrink_sequence + tanh -> latent -----------------------------------
    latent = jnp.tanh(
        jnp.dot(h1, w2_ref[...], preferred_element_type=jnp.float32)
        + b2_ref[...])                                     # (Bp, latent)

    # ---- decode_latent -------------------------------------------------------
    d = (jnp.dot(latent.astype(jnp.bfloat16), w3_ref[...],
                 preferred_element_type=jnp.float32) + b3_ref[...])

    # ---- grow_sequence -------------------------------------------------------
    g = (jnp.dot(d.astype(jnp.bfloat16), w4_ref[...],
                 preferred_element_type=jnp.float32) + b4_ref[...])
    g = g.astype(jnp.bfloat16)                             # (Bp, S*TOK)

    # ---- grow_tokens: per position, (Bp, TOK) @ (TOK, dim_m) + b5 -----------
    w5 = w5_ref[...]
    b5 = b5_ref[...]
    for s in range(seq):                                   # static unroll
        gs = g[:, s * TOK:(s + 1) * TOK]
        o_ref[:, s * dim_m:(s + 1) * dim_m] = (
            jnp.dot(gs, w5, preferred_element_type=jnp.float32) + b5
        ).astype(o_ref.dtype)


# ---------------------------------------------------------------------------
# Parameter construction (PyTorch-Linear-style init, then lane-dense padding)
# ---------------------------------------------------------------------------
def _linear_params(key, in_f, out_f, dtype=jnp.float32):
    kw, kb = jax.random.split(key)
    bound = 1.0 / jnp.sqrt(jnp.float32(in_f))
    w = jax.random.uniform(kw, (in_f, out_f), dtype, -bound, bound)
    b = jax.random.uniform(kb, (out_f,), dtype, -bound, bound)
    return w, b


def init_vae_params(key, dim_m, set_seq_size, latent_size):
    assert dim_m > 100
    S = set_seq_size
    keys = jax.random.split(key, 5)

    w1, b1 = _linear_params(keys[0], dim_m, 100)            # shrink_tokens
    w2, b2 = _linear_params(keys[1], 100 * S, latent_size)  # shrink_sequence
    w3, b3 = _linear_params(keys[2], latent_size, 10 * S)   # decode_latent
    w4, b4 = _linear_params(keys[3], 10 * S, 100 * S)       # grow_sequence
    w5, b5 = _linear_params(keys[4], 100, dim_m)            # grow_tokens

    pad_tok = TOK - 100
    t10 = 10 * S
    t10p = _round_up(t10, 128)
    pad_t10 = t10p - t10

    # shrink_tokens: pad output cols 100 -> 128 (bias cols zero too).
    w1p = jnp.pad(w1, ((0, 0), (0, pad_tok)))
    b1p = jnp.pad(b1, (0, pad_tok))
    # shrink_sequence: pad the matching input rows (per token) with zeros.
    w2p = jnp.pad(
        w2.reshape(S, 100, latent_size), ((0, 0), (0, pad_tok), (0, 0))
    ).reshape(S * TOK, latent_size)
    # decode_latent: pad output cols 10*S -> t10p (bias zero too).
    w3p = jnp.pad(w3, ((0, 0), (0, pad_t10)))
    b3p = jnp.pad(b3, (0, pad_t10))
    # grow_sequence: pad input rows 10*S -> t10p and per-token output 100 -> 128.
    w4p = jnp.pad(
        w4.reshape(t10, S, 100), ((0, pad_t10), (0, 0), (0, pad_tok))
    ).reshape(t10p, S * TOK)
    b4p = jnp.pad(b4.reshape(S, 100), ((0, 0), (0, pad_tok))).reshape(S * TOK)
    # grow_tokens: pad matching input rows with zeros.
    w5p = jnp.pad(w5, ((0, pad_tok), (0, 0)))

    bf16, f32 = jnp.bfloat16, jnp.float32
    return {
        "shrink_tokens": (w1p.astype(bf16), b1p.reshape(1, -1).astype(f32)),
        "shrink_sequence": (w2p.astype(bf16), b2.reshape(1, -1).astype(f32)),
        "decode_latent": (w3p.astype(bf16), b3p.reshape(1, -1).astype(f32)),
        "grow_sequence": (w4p.astype(bf16), b4p.reshape(1, -1).astype(f32)),
        "grow_tokens": (w5p.astype(bf16), b5.reshape(1, -1).astype(f32)),
    }


# ---------------------------------------------------------------------------
# Module forward passes
# ---------------------------------------------------------------------------
def mmd_vae_forward(params, hidden):
    """MMD_VAE: hidden (B, S, dim_m) f32 -> (reconstruction f32, loss)."""
    B, S, D = hidden.shape
    w1, b1 = params["shrink_tokens"]      # (D, 128)
    w2, b2 = params["shrink_sequence"]    # (S*128, latent)
    w3, b3 = params["decode_latent"]      # (latent, t10p)
    w4, b4 = params["grow_sequence"]      # (t10p, S*128)
    w5, b5 = params["grow_tokens"]        # (128, D)
    assert w5.shape[1] == D

    Bp = _round_up(max(B, 1), 8)          # sublane-pad tiny batch dim once
    x = hidden.reshape(B, S * D)
    if Bp != B:
        x = jnp.pad(x, ((0, Bp - B), (0, 0)))
    x = x.astype(jnp.bfloat16)

    latent_size = w2.shape[1]
    t10p = w3.shape[1]

    arrays = (x, w1, b1, w2, b2, w3, b3, w4, b4, w5, b5)
    in_bytes = sum(int(a.size) * a.dtype.itemsize for a in arrays)
    out_bytes = Bp * S * D * 4
    scratch_bytes = Bp * S * TOK * 4
    # Tight, footprint-derived VMEM limit (with headroom); stays well under
    # v7x's 64 MiB per-core VMEM.
    vmem_limit = min(64 * 1024 * 1024,
                     max(8 * 1024 * 1024,
                         4 * (in_bytes + out_bytes + scratch_bytes)))

    flops = 2 * Bp * (S * D * TOK + S * TOK * latent_size
                      + latent_size * t10p + t10p * S * TOK + S * TOK * D)
    cost = pl.CostEstimate(
        flops=flops,
        transcendentals=Bp * latent_size,
        bytes_accessed=in_bytes + out_bytes,
    )

    vmem_spec = pl.BlockSpec(memory_space=pltpu.MemorySpace.VMEM)
    out = pl.pallas_call(
        functools.partial(_fused_vae_kernel, seq=S, dim_m=D),
        out_shape=jax.ShapeDtypeStruct((Bp, S * D), jnp.float32),
        in_specs=[vmem_spec] * len(arrays),
        out_specs=vmem_spec,
        scratch_shapes=[pltpu.VMEM((Bp, S * TOK), jnp.float32)],
        compiler_params=pltpu.CompilerParams(vmem_limit_bytes=vmem_limit),
        cost_estimate=cost,
    )(*arrays)

    recon = out[:B].reshape(B, S, D)
    loss = jnp.array(0, dtype=jnp.int32)   # torch.tensor(0)
    return recon, loss


@jax.jit
def reformer_vae_encoder_forward(params, hidden_states):
    """ReformerVAE_Encoder.forward."""
    # TODO(synk): ReformerEncoder not provided; encoder_1 is an identity pass.
    enc1_last_hidden = hidden_states
    hidden_state, loss = mmd_vae_forward(params, enc1_last_hidden)
    # TODO(synk): ReformerEncoder not provided; encoder_2 is an identity pass
    # over the appended VAE-reconstructed hidden state.
    enc2_output = hidden_state
    return enc2_output, loss


# ---------------------------------------------------------------------------
# Pure-JAX reference (same bf16-activation / f32-accumulate quantisation)
# ---------------------------------------------------------------------------
def _reference_forward(params, hidden):
    def dense(x, w, b, act=None):
        y = (x.astype(jnp.bfloat16).astype(jnp.float32)
             @ w.astype(jnp.float32)) + b.astype(jnp.float32)
        return jnp.tanh(y) if act == "tanh" else y

    B, S, D = hidden.shape
    w1, b1 = params["shrink_tokens"]
    w2, b2 = params["shrink_sequence"]
    w3, b3 = params["decode_latent"]
    w4, b4 = params["grow_sequence"]
    w5, b5 = params["grow_tokens"]
    h = dense(hidden.reshape(B * S, D), w1, b1)                    # (B*S, 128)
    latent = dense(h.reshape(B, S * TOK), w2, b2, act="tanh")      # (B, L)
    d = dense(latent, w3, b3)                                      # (B, t10p)
    g = dense(d, w4, b4)                                           # (B, S*128)
    out = dense(g.reshape(B * S, TOK), w5, b5)                     # (B*S, D)
    return out.reshape(B, S, D)


# ---------------------------------------------------------------------------
# Main
# ---------------------------------------------------------------------------
if __name__ == "__main__":
    DIM_M = 128        # config.hidden_size  (must be > 100)
    SET_SEQ = 8        # config.set_seq_size
    LATENT = 128       # config.latent_size
    BATCH = 2

    key = jax.random.PRNGKey(0)
    k_params, k_input = jax.random.split(key)

    params = init_vae_params(k_params, DIM_M, SET_SEQ, LATENT)
    hidden_states = jax.random.normal(
        k_input, (BATCH, SET_SEQ, DIM_M), dtype=jnp.float32
    )

    out, loss = reformer_vae_encoder_forward(params, hidden_states)
    out = jax.block_until_ready(out)
    loss = jax.block_until_ready(loss)

    ref = _reference_forward(params, hidden_states)
    assert out.shape == (BATCH, SET_SEQ, DIM_M), out.shape
    assert jnp.allclose(out, ref, atol=5e-3, rtol=5e-3), (
        "mismatch vs reference: max abs diff = "
        + str(float(jnp.max(jnp.abs(out - ref))))
    )
    assert int(loss) == 0

    print("KERNEL_OK")
</pallas_src>

<mosaic_0001>
module attributes {stable_mosaic.version = 11 : i64} {
  func.func @_fused_vae_kernel(%arg0: memref<8x1024xbf16, #tpu.memory_space<vmem>>, %arg1: memref<128x128xbf16, #tpu.memory_space<vmem>>, %arg2: memref<1x128xf32, #tpu.memory_space<vmem>>, %arg3: memref<1024x128xbf16, #tpu.memory_space<vmem>>, %arg4: memref<1x128xf32, #tpu.memory_space<vmem>>, %arg5: memref<128x128xbf16, #tpu.memory_space<vmem>>, %arg6: memref<1x128xf32, #tpu.memory_space<vmem>>, %arg7: memref<128x1024xbf16, #tpu.memory_space<vmem>>, %arg8: memref<1x1024xf32, #tpu.memory_space<vmem>>, %arg9: memref<128x128xbf16, #tpu.memory_space<vmem>>, %arg10: memref<1x128xf32, #tpu.memory_space<vmem>>, %arg11: memref<8x1024xf32, #tpu.memory_space<vmem>>, %arg12: memref<8x1024xf32, #tpu.memory_space<vmem>>) attributes {dimension_semantics = [], scalar_prefetch = 0 : i64, scratch_operands = 1 : i64, tpu.core_type = #tpu.core_type<tc>} {
    %c0 = arith.constant 0 : index
    %c0_0 = arith.constant 0 : index
    %0 = vector.load %arg1[%c0, %c0_0] : memref<128x128xbf16, #tpu.memory_space<vmem>>, vector<128x128xbf16>
    %c0_1 = arith.constant 0 : index
    %c0_2 = arith.constant 0 : index
    %1 = vector.load %arg2[%c0_1, %c0_2] : memref<1x128xf32, #tpu.memory_space<vmem>>, vector<1x128xf32>
    %c0_3 = arith.constant 0 : index
    %c0_4 = arith.constant 0 : index
    %2 = vector.load %arg0[%c0_3, %c0_4] : memref<8x1024xbf16, #tpu.memory_space<vmem>>, vector<8x128xbf16>
    %cst = arith.constant dense<0.000000e+00> : vector<8x128xf32>
    %3 = tpu.matmul %2, %0, %cst {dimension_numbers = #tpu.dot_dimension_numbers<[1], [0], [0], [1], [0, 0, 1, 1], [], []>} : vector<8x128xbf16>, vector<128x128xbf16>, vector<8x128xf32> -> vector<8x128xf32>
    %4 = vector.broadcast %1 : vector<1x128xf32> to vector<8x128xf32>
    %5 = arith.addf %3, %4 : vector<8x128xf32>
    %c0_5 = arith.constant 0 : index
    %c0_6 = arith.constant 0 : index
    %6 = vector.load %arg12[%c0_5, %c0_6] : memref<8x1024xf32, #tpu.memory_space<vmem>>, vector<8x128xf32>
    tpu.vector_store %arg12[%c0_5, %c0_6], %5 {strides = array<i32>} : memref<8x1024xf32, #tpu.memory_space<vmem>>, vector<8x128xf32>,
    %c0_7 = arith.constant 0 : index
    %c128 = arith.constant 128 : index
    %7 = vector.load %arg0[%c0_7, %c128] : memref<8x1024xbf16, #tpu.memory_space<vmem>>, vector<8x128xbf16>
    %cst_8 = arith.constant dense<0.000000e+00> : vector<8x128xf32>
    %8 = tpu.matmul %7, %0, %cst_8 {dimension_numbers = #tpu.dot_dimension_numbers<[1], [0], [0], [1], [0, 0, 1, 1], [], []>} : vector<8x128xbf16>, vector<128x128xbf16>, vector<8x128xf32> -> vector<8x128xf32>
    %9 = vector.broadcast %1 : vector<1x128xf32> to vector<8x128xf32>
    %10 = arith.addf %8, %9 : vector<8x128xf32>
    %c0_9 = arith.constant 0 : index
    %c128_10 = arith.constant 128 : index
    %11 = vector.load %arg12[%c0_9, %c128_10] : memref<8x1024xf32, #tpu.memory_space<vmem>>, vector<8x128xf32>
    tpu.vector_store %arg12[%c0_9, %c128_10], %10 {strides = array<i32>} : memref<8x1024xf32, #tpu.memory_space<vmem>>, vector<8x128xf32>,
    %c0_11 = arith.constant 0 : index
    %c256 = arith.constant 256 : index
    %12 = vector.load %arg0[%c0_11, %c256] : memref<8x1024xbf16, #tpu.memory_space<vmem>>, vector<8x128xbf16>
    %cst_12 = arith.constant dense<0.000000e+00> : vector<8x128xf32>
    %13 = tpu.matmul %12, %0, %cst_12 {dimension_numbers = #tpu.dot_dimension_numbers<[1], [0], [0], [1], [0, 0, 1, 1], [], []>} : vector<8x128xbf16>, vector<128x128xbf16>, vector<8x128xf32> -> vector<8x128xf32>
    %14 = vector.broadcast %1 : vector<1x128xf32> to vector<8x128xf32>
    %15 = arith.addf %13, %14 : vector<8x128xf32>
    %c0_13 = arith.constant 0 : index
    %c256_14 = arith.constant 256 : index
    %16 = vector.load %arg12[%c0_13, %c256_14] : memref<8x1024xf32, #tpu.memory_space<vmem>>, vector<8x128xf32>
    tpu.vector_store %arg12[%c0_13, %c256_14], %15 {strides = array<i32>} : memref<8x1024xf32, #tpu.memory_space<vmem>>, vector<8x128xf32>,
    %c0_15 = arith.constant 0 : index
    %c384 = arith.constant 384 : index
    %17 = vector.load %arg0[%c0_15, %c384] : memref<8x1024xbf16, #tpu.memory_space<vmem>>, vector<8x128xbf16>
    %cst_16 = arith.constant dense<0.000000e+00> : vector<8x128xf32>
    %18 = tpu.matmul %17, %0, %cst_16 {dimension_numbers = #tpu.dot_dimension_numbers<[1], [0], [0], [1], [0, 0, 1, 1], [], []>} : vector<8x128xbf16>, vector<128x128xbf16>, vector<8x128xf32> -> vector<8x128xf32>
    %19 = vector.broadcast %1 : vector<1x128xf32> to vector<8x128xf32>
    %20 = arith.addf %18, %19 : vector<8x128xf32>
    %c0_17 = arith.constant 0 : index
    %c384_18 = arith.constant 384 : index
    %21 = vector.load %arg12[%c0_17, %c384_18] : memref<8x1024xf32, #tpu.memory_space<vmem>>, vector<8x128xf32>
    tpu.vector_store %arg12[%c0_17, %c384_18], %20 {strides = array<i32>} : memref<8x1024xf32, #tpu.memory_space<vmem>>, vector<8x128xf32>,
    %c0_19 = arith.constant 0 : index
    %c512 = arith.constant 512 : index
    %22 = vector.load %arg0[%c0_19, %c512] : memref<8x1024xbf16, #tpu.memory_space<vmem>>, vector<8x128xbf16>
    %cst_20 = arith.constant dense<0.000000e+00> : vector<8x128xf32>
    %23 = tpu.matmul %22, %0, %cst_20 {dimension_numbers = #tpu.dot_dimension_numbers<[1], [0], [0], [1], [0, 0, 1, 1], [], []>} : vector<8x128xbf16>, vector<128x128xbf16>, vector<8x128xf32> -> vector<8x128xf32>
    %24 = vector.broadcast %1 : vector<1x128xf32> to vector<8x128xf32>
    %25 = arith.addf %23, %24 : vector<8x128xf32>
    %c0_21 = arith.constant 0 : index
    %c512_22 = arith.constant 512 : index
    %26 = vector.load %arg12[%c0_21, %c512_22] : memref<8x1024xf32, #tpu.memory_space<vmem>>, vector<8x128xf32>
    tpu.vector_store %arg12[%c0_21, %c512_22], %25 {strides = array<i32>} : memref<8x1024xf32, #tpu.memory_space<vmem>>, vector<8x128xf32>,
    %c0_23 = arith.constant 0 : index
    %c640 = arith.constant 640 : index
    %27 = vector.load %arg0[%c0_23, %c640] : memref<8x1024xbf16, #tpu.memory_space<vmem>>, vector<8x128xbf16>
    %cst_24 = arith.constant dense<0.000000e+00> : vector<8x128xf32>
    %28 = tpu.matmul %27, %0, %cst_24 {dimension_numbers = #tpu.dot_dimension_numbers<[1], [0], [0], [1], [0, 0, 1, 1], [], []>} : vector<8x128xbf16>, vector<128x128xbf16>, vector<8x128xf32> -> vector<8x128xf32>
    %29 = vector.broadcast %1 : vector<1x128xf32> to vector<8x128xf32>
    %30 = arith.addf %28, %29 : vector<8x128xf32>
    %c0_25 = arith.constant 0 : index
    %c640_26 = arith.constant 640 : index
    %31 = vector.load %arg12[%c0_25, %c640_26] : memref<8x1024xf32, #tpu.memory_space<vmem>>, vector<8x128xf32>
    tpu.vector_store %arg12[%c0_25, %c640_26], %30 {strides = array<i32>} : memref<8x1024xf32, #tpu.memory_space<vmem>>, vector<8x128xf32>,
    %c0_27 = arith.constant 0 : index
    %c768 = arith.constant 768 : index
    %32 = vector.load %arg0[%c0_27, %c768] : memref<8x1024xbf16, #tpu.memory_space<vmem>>, vector<8x128xbf16>
    %cst_28 = arith.constant dense<0.000000e+00> : vector<8x128xf32>
    %33 = tpu.matmul %32, %0, %cst_28 {dimension_numbers = #tpu.dot_dimension_numbers<[1], [0], [0], [1], [0, 0, 1, 1], [], []>} : vector<8x128xbf16>, vector<128x128xbf16>, vector<8x128xf32> -> vector<8x128xf32>
    %34 = vector.broadcast %1 : vector<1x128xf32> to vector<8x128xf32>
    %35 = arith.addf %33, %34 : vector<8x128xf32>
    %c0_29 = arith.constant 0 : index
    %c768_30 = arith.constant 768 : index
    %36 = vector.load %arg12[%c0_29, %c768_30] : memref<8x1024xf32, #tpu.memory_space<vmem>>, vector<8x128xf32>
    tpu.vector_store %arg12[%c0_29, %c768_30], %35 {strides = array<i32>} : memref<8x1024xf32, #tpu.memory_space<vmem>>, vector<8x128xf32>,
    %c0_31 = arith.constant 0 : index
    %c896 = arith.constant 896 : index
    %37 = vector.load %arg0[%c0_31, %c896] : memref<8x1024xbf16, #tpu.memory_space<vmem>>, vector<8x128xbf16>
    %cst_32 = arith.constant dense<0.000000e+00> : vector<8x128xf32>
    %38 = tpu.matmul %37, %0, %cst_32 {dimension_numbers = #tpu.dot_dimension_numbers<[1], [0], [0], [1], [0, 0, 1, 1], [], []>} : vector<8x128xbf16>, vector<128x128xbf16>, vector<8x128xf32> -> vector<8x128xf32>
    %39 = vector.broadcast %1 : vector<1x128xf32> to vector<8x128xf32>
    %40 = arith.addf %38, %39 : vector<8x128xf32>
    %c0_33 = arith.constant 0 : index
    %c896_34 = arith.constant 896 : index
    %41 = vector.load %arg12[%c0_33, %c896_34] : memref<8x1024xf32, #tpu.memory_space<vmem>>, vector<8x128xf32>
    tpu.vector_store %arg12[%c0_33, %c896_34], %40 {strides = array<i32>} : memref<8x1024xf32, #tpu.memory_space<vmem>>, vector<8x128xf32>,
    %c0_35 = arith.constant 0 : index
    %c0_36 = arith.constant 0 : index
    %42 = vector.load %arg12[%c0_35, %c0_36] : memref<8x1024xf32, #tpu.memory_space<vmem>>, vector<8x1024xf32>
    %43 = arith.truncf %42 : vector<8x1024xf32> to vector<8x1024xbf16>
    %c0_37 = arith.constant 0 : index
    %c0_38 = arith.constant 0 : index
    %44 = vector.load %arg3[%c0_37, %c0_38] : memref<1024x128xbf16, #tpu.memory_space<vmem>>, vector<1024x128xbf16>
    %cst_39 = arith.constant dense<0.000000e+00> : vector<8x128xf32>
    %45 = tpu.matmul %43, %44, %cst_39 {dimension_numbers = #tpu.dot_dimension_numbers<[1], [0], [0], [1], [0, 0, 1, 1], [], []>} : vector<8x1024xbf16>, vector<1024x128xbf16>, vector<8x128xf32> -> vector<8x128xf32>
    %c0_40 = arith.constant 0 : index
    %c0_41 = arith.constant 0 : index
    %46 = vector.load %arg4[%c0_40, %c0_41] : memref<1x128xf32, #tpu.memory_space<vmem>>, vector<1x128xf32>
    %47 = vector.broadcast %46 : vector<1x128xf32> to vector<8x128xf32>
    %48 = arith.addf %45, %47 : vector<8x128xf32>
    %49 = math.tanh %48 : vector<8x128xf32>
    %50 = arith.truncf %49 : vector<8x128xf32> to vector<8x128xbf16>
    %c0_42 = arith.constant 0 : index
    %c0_43 = arith.constant 0 : index
    %51 = vector.load %arg5[%c0_42, %c0_43] : memref<128x128xbf16, #tpu.memory_space<vmem>>, vector<128x128xbf16>
    %cst_44 = arith.constant dense<0.000000e+00> : vector<8x128xf32>
    %52 = tpu.matmul %50, %51, %cst_44 {dimension_numbers = #tpu.dot_dimension_numbers<[1], [0], [0], [1], [0, 0, 1, 1], [], []>} : vector<8x128xbf16>, vector<128x128xbf16>, vector<8x128xf32> -> vector<8x128xf32>
    %c0_45 = arith.constant 0 : index
    %c0_46 = arith.constant 0 : index
    %53 = vector.load %arg6[%c0_45, %c0_46] : memref<1x128xf32, #tpu.memory_space<vmem>>, vector<1x128xf32>
    %54 = vector.broadcast %53 : vector<1x128xf32> to vector<8x128xf32>
    %55 = arith.addf %52, %54 : vector<8x128xf32>
    %56 = arith.truncf %55 : vector<8x128xf32> to vector<8x128xbf16>
    %c0_47 = arith.constant 0 : index
    %c0_48 = arith.constant 0 : index
    %57 = vector.load %arg7[%c0_47, %c0_48] : memref<128x1024xbf16, #tpu.memory_space<vmem>>, vector<128x1024xbf16>
    %cst_49 = arith.constant dense<0.000000e+00> : vector<8x1024xf32>
    %58 = tpu.matmul %56, %57, %cst_49 {dimension_numbers = #tpu.dot_dimension_numbers<[1], [0], [0], [1], [0, 0, 1, 1], [], []>} : vector<8x128xbf16>, vector<128x1024xbf16>, vector<8x1024xf32> -> vector<8x1024xf32>
    %c0_50 = arith.constant 0 : index
    %c0_51 = arith.constant 0 : index
    %59 = vector.load %arg8[%c0_50, %c0_51] : memref<1x1024xf32, #tpu.memory_space<vmem>>, vector<1x1024xf32>
    %60 = vector.broadcast %59 : vector<1x1024xf32> to vector<8x1024xf32>
    %61 = arith.addf %58, %60 : vector<8x1024xf32>
    %62 = arith.truncf %61 : vector<8x1024xf32> to vector<8x1024xbf16>
    %c0_52 = arith.constant 0 : index
    %c0_53 = arith.constant 0 : index
    %63 = vector.load %arg9[%c0_52, %c0_53] : memref<128x128xbf16, #tpu.memory_space<vmem>>, vector<128x128xbf16>
    %c0_54 = arith.constant 0 : index
    %c0_55 = arith.constant 0 : index
    %64 = vector.load %arg10[%c0_54, %c0_55] : memref<1x128xf32, #tpu.memory_space<vmem>>, vector<1x128xf32>
    %65 = vector.extract_strided_slice %62 {offsets = [0, 0], sizes = [8, 128], strides = [1, 1]} : vector<8x1024xbf16> to vector<8x128xbf16>
    %cst_56 = arith.constant dense<0.000000e+00> : vector<8x128xf32>
    %66 = tpu.matmul %65, %63, %cst_56 {dimension_numbers = #tpu.dot_dimension_numbers<[1], [0], [0], [1], [0, 0, 1, 1], [], []>} : vector<8x128xbf16>, vector<128x128xbf16>, vector<8x128xf32> -> vector<8x128xf32>
    %67 = vector.broadcast %64 : vector<1x128xf32> to vector<8x128xf32>
    %68 = arith.addf %66, %67 : vector<8x128xf32>
    %c0_57 = arith.constant 0 : index
    %c0_58 = arith.constant 0 : index
    %69 = vector.load %arg11[%c0_57, %c0_58] : memref<8x1024xf32, #tpu.memory_space<vmem>>, vector<8x128xf32>
    tpu.vector_store %arg11[%c0_57, %c0_58], %68 {strides = array<i32>} : memref<8x1024xf32, #tpu.memory_space<vmem>>, vector<8x128xf32>,
    %70 = vector.extract_strided_slice %62 {offsets = [0, 128], sizes = [8, 128], strides = [1, 1]} : vector<8x1024xbf16> to vector<8x128xbf16>
    %cst_59 = arith.constant dense<0.000000e+00> : vector<8x128xf32>
    %71 = tpu.matmul %70, %63, %cst_59 {dimension_numbers = #tpu.dot_dimension_numbers<[1], [0], [0], [1], [0, 0, 1, 1], [], []>} : vector<8x128xbf16>, vector<128x128xbf16>, vector<8x128xf32> -> vector<8x128xf32>
    %72 = vector.broadcast %64 : vector<1x128xf32> to vector<8x128xf32>
    %73 = arith.addf %71, %72 : vector<8x128xf32>
    %c0_60 = arith.constant 0 : index
    %c128_61 = arith.constant 128 : index
    %74 = vector.load %arg11[%c0_60, %c128_61] : memref<8x1024xf32, #tpu.memory_space<vmem>>, vector<8x128xf32>
    tpu.vector_store %arg11[%c0_60, %c128_61], %73 {strides = array<i32>} : memref<8x1024xf32, #tpu.memory_space<vmem>>, vector<8x128xf32>,
    %75 = vector.extract_strided_slice %62 {offsets = [0, 256], sizes = [8, 128], strides = [1, 1]} : vector<8x1024xbf16> to vector<8x128xbf16>
    %cst_62 = arith.constant dense<0.000000e+00> : vector<8x128xf32>
    %76 = tpu.matmul %75, %63, %cst_62 {dimension_numbers = #tpu.dot_dimension_numbers<[1], [0], [0], [1], [0, 0, 1, 1], [], []>} : vector<8x128xbf16>, vector<128x128xbf16>, vector<8x128xf32> -> vector<8x128xf32>
    %77 = vector.broadcast %64 : vector<1x128xf32> to vector<8x128xf32>
    %78 = arith.addf %76, %77 : vector<8x128xf32>
    %c0_63 = arith.constant 0 : index
    %c256_64 = arith.constant 256 : index
    %79 = vector.load %arg11[%c0_63, %c256_64] : memref<8x1024xf32, #tpu.memory_space<vmem>>, vector<8x128xf32>
    tpu.vector_store %arg11[%c0_63, %c256_64], %78 {strides = array<i32>} : memref<8x1024xf32, #tpu.memory_space<vmem>>, vector<8x128xf32>,
    %80 = vector.extract_strided_slice %62 {offsets = [0, 384], sizes = [8, 128], strides = [1, 1]} : vector<8x1024xbf16> to vector<8x128xbf16>
    %cst_65 = arith.constant dense<0.000000e+00> : vector<8x128xf32>
    %81 = tpu.matmul %80, %63, %cst_65 {dimension_numbers = #tpu.dot_dimension_numbers<[1], [0], [0], [1], [0, 0, 1, 1], [], []>} : vector<8x128xbf16>, vector<128x128xbf16>, vector<8x128xf32> -> vector<8x128xf32>
    %82 = vector.broadcast %64 : vector<1x128xf32> to vector<8x128xf32>
    %83 = arith.addf %81, %82 : vector<8x128xf32>
    %c0_66 = arith.constant 0 : index
    %c384_67 = arith.constant 384 : index
    %84 = vector.load %arg11[%c0_66, %c384_67] : memref<8x1024xf32, #tpu.memory_space<vmem>>, vector<8x128xf32>
    tpu.vector_store %arg11[%c0_66, %c384_67], %83 {strides = array<i32>} : memref<8x1024xf32, #tpu.memory_space<vmem>>, vector<8x128xf32>,
    %85 = vector.extract_strided_slice %62 {offsets = [0, 512], sizes = [8, 128], strides = [1, 1]} : vector<8x1024xbf16> to vector<8x128xbf16>
    %cst_68 = arith.constant dense<0.000000e+00> : vector<8x128xf32>
    %86 = tpu.matmul %85, %63, %cst_68 {dimension_numbers = #tpu.dot_dimension_numbers<[1], [0], [0], [1], [0, 0, 1, 1], [], []>} : vector<8x128xbf16>, vector<128x128xbf16>, vector<8x128xf32> -> vector<8x128xf32>
    %87 = vector.broadcast %64 : vector<1x128xf32> to vector<8x128xf32>
    %88 = arith.addf %86, %87 : vector<8x128xf32>
    %c0_69 = arith.constant 0 : index
    %c512_70 = arith.constant 512 : index
    %89 = vector.load %arg11[%c0_69, %c512_70] : memref<8x1024xf32, #tpu.memory_space<vmem>>, vector<8x128xf32>
    tpu.vector_store %arg11[%c0_69, %c512_70], %88 {strides = array<i32>} : memref<8x1024xf32, #tpu.memory_space<vmem>>, vector<8x128xf32>,
    %90 = vector.extract_strided_slice %62 {offsets = [0, 640], sizes = [8, 128], strides = [1, 1]} : vector<8x1024xbf16> to vector<8x128xbf16>
    %cst_71 = arith.constant dense<0.000000e+00> : vector<8x128xf32>
    %91 = tpu.matmul %90, %63, %cst_71 {dimension_numbers = #tpu.dot_dimension_numbers<[1], [0], [0], [1], [0, 0, 1, 1], [], []>} : vector<8x128xbf16>, vector<128x128xbf16>, vector<8x128xf32> -> vector<8x128xf32>
    %92 = vector.broadcast %64 : vector<1x128xf32> to vector<8x128xf32>
    %93 = arith.addf %91, %92 : vector<8x128xf32>
    %c0_72 = arith.constant 0 : index
    %c640_73 = arith.constant 640 : index
    %94 = vector.load %arg11[%c0_72, %c640_73] : memref<8x1024xf32, #tpu.memory_space<vmem>>, vector<8x128xf32>
    tpu.vector_store %arg11[%c0_72, %c640_73], %93 {strides = array<i32>} : memref<8x1024xf32, #tpu.memory_space<vmem>>, vector<8x128xf32>,
    %95 = vector.extract_strided_slice %62 {offsets = [0, 768], sizes = [8, 128], strides = [1, 1]} : vector<8x1024xbf16> to vector<8x128xbf16>
    %cst_74 = arith.constant dense<0.000000e+00> : vector<8x128xf32>
    %96 = tpu.matmul %95, %63, %cst_74 {dimension_numbers = #tpu.dot_dimension_numbers<[1], [0], [0], [1], [0, 0, 1, 1], [], []>} : vector<8x128xbf16>, vector<128x128xbf16>, vector<8x128xf32> -> vector<8x128xf32>
    %97 = vector.broadcast %64 : vector<1x128xf32> to vector<8x128xf32>
    %98 = arith.addf %96, %97 : vector<8x128xf32>
    %c0_75 = arith.constant 0 : index
    %c768_76 = arith.constant 768 : index
    %99 = vector.load %arg11[%c0_75, %c768_76] : memref<8x1024xf32, #tpu.memory_space<vmem>>, vector<8x128xf32>
    tpu.vector_store %arg11[%c0_75, %c768_76], %98 {strides = array<i32>} : memref<8x1024xf32, #tpu.memory_space<vmem>>, vector<8x128xf32>,
    %100 = vector.extract_strided_slice %62 {offsets = [0, 896], sizes = [8, 128], strides = [1, 1]} : vector<8x1024xbf16> to vector<8x128xbf16>
    %cst_77 = arith.constant dense<0.000000e+00> : vector<8x128xf32>
    %101 = tpu.matmul %100, %63, %cst_77 {dimension_numbers = #tpu.dot_dimension_numbers<[1], [0], [0], [1], [0, 0, 1, 1], [], []>} : vector<8x128xbf16>, vector<128x128xbf16>, vector<8x128xf32> -> vector<8x128xf32>
    %102 = vector.broadcast %64 : vector<1x128xf32> to vector<8x128xf32>
    %103 = arith.addf %101, %102 : vector<8x128xf32>
    %c0_78 = arith.constant 0 : index
    %c896_79 = arith.constant 896 : index
    %104 = vector.load %arg11[%c0_78, %c896_79] : memref<8x1024xf32, #tpu.memory_space<vmem>>, vector<8x128xf32>
    tpu.vector_store %arg11[%c0_78, %c896_79], %103 {strides = array<i32>} : memref<8x1024xf32, #tpu.memory_space<vmem>>, vector<8x128xf32>,
    return
  }
}

</mosaic_0001>

<bundles_post_ra>
// kernel: reformer_vae_encoder_forward.1
= control target key start
LH: loop header
LB: loop body
LE: loop exit
PB: predicated region body
PF: predicated region fallthrough
CT: control target
= control target key end

     0   :  { %16 = vsyncpa [#allocation4], 0  ;;  %s3800_s0 = inlined_call_operand.vmem [shape: bf16[8,1024], index: 0, kind: input, shape index: {}]   ;;  %s3801_s1 = inlined_call_operand.vmem [shape: bf16[128,128], index: 1, kind: input, shape index: {}]   ;;  %s3802_s2 = inlined_call_operand.vmem [shape: f32[1,128], index: 2, kind: input, shape index: {}]   ;;  %s3803_s3 = inlined_call_operand.hbm [shape: bf16[1024,128], index: 3, kind: input, shape index: {}]   ;;  %s3804_s4 = inlined_call_operand.vmem [shape: f32[1,128], index: 4, kind: input, shape index: {}]   ;;  %s3805_s5 = inlined_call_operand.hbm [shape: bf16[128,128], index: 5, kind: input, shape index: {}]   ;;  %s3806_s6 = inlined_call_operand.vmem [shape: f32[1,128], index: 6, kind: input, shape index: {}]   ;;  %s3807_s7 = inlined_call_operand.hbm [shape: bf16[128,1024], index: 7, kind: input, shape index: {}]   ;;  %s3808_s8 = inlined_call_operand.vmem [shape: f32[1,1024], index: 8, kind: input, shape index: {}]   ;;  %s3809_s9 = inlined_call_operand.hbm [shape: bf16[128,128], index: 9, kind: input, shape index: {}]   ;;  %s3810_s10 = inlined_call_operand.vmem [shape: f32[1,128], index: 10, kind: input, shape index: {}]   ;;  %s3811_s11 = inlined_call_operand.vmem [shape: f32[8,1024], index: 11, kind: output, shape index: {}]  }
   0x1   :  { %17 = vsyncpa [#allocation6], 0 }
   0x2   :  { %18 = vsyncpa [#allocation9], 0  ;;  %s3238_s17 = smov [#allocation5]   ;;  %s3239_s19 = smov [#allocation3]  }
   0x3   :  { %s44_s18 = sshll.u32 %s3238_s17, 4  ;;  %s30_s20 = sshll.u32 %s3239_s19, 4  ;;  %s45_s18 = int_to_ptr.vmem [resolvable:$true] %s44_s18  ;;  %s31_s20 = int_to_ptr.vmem [resolvable:$true] %s30_s20 }
   0x4   :  { %s3160_s21 = scalar_lea.vmem %s45_s18, 1024  ;;  %p3165_p1 = scmp.lt.s32.totalorder %s45_s18, %s45_s18 }
   0x5   :  { %p3161_p0 = scmp.ne.s32.totalorder %s45_s18, %s3160_s21  ;;  %p3166_p2 = scmp.lt.s32.totalorder %s3160_s21, %s3160_s21 }
   0x7   :  { %p3167_p3 = por %p3166_p2, %p3165_p1 }
   0x9   :  { %p3168_p4 = pnand %p3167_p3, %p3161_p0 }
   0xb   :  { %3171 = shalt.err (!%p3168_p4)
}
   0xc   :  { %s3240_s22 = smov 64   ;;  %s3241_s23 = smov 4  }
   0xd   :  { %50 = dma.hbm_to_vmem [thread:$0]  %s3805_s5, 1024, %s45_s18, [#allocation6], %s3240_s22, %s3240_s22, %s3241_s23  }
   0xe   :  { %s3180_s26 = scalar_lea.vmem %s31_s20, 8192  ;;  %p3185_p6 = scmp.lt.s32.totalorder %s31_s20, %s31_s20 }
   0xf   :  { %p3181_p5 = scmp.ne.s32.totalorder %s31_s20, %s3180_s26  ;;  %p3186_p7 = scmp.lt.s32.totalorder %s3180_s26, %s3180_s26 }
  0x11   :  { %p3187_p8 = por %p3186_p7, %p3185_p6 }
  0x13   :  { %p3188_p9 = pnand %p3187_p8, %p3181_p5 }
  0x15   :  { %3191 = shalt.err (!%p3188_p9)
}
  0x16   :  { %36 = dma.hbm_to_vmem [thread:$0]  %s3803_s3, 8192, %s31_s20, [#allocation4], %s3240_s22, %s3240_s22, %s3241_s23  }
  0x17   :  { %s3242_s29 = smov [#allocation7]  }
  0x18   :  { %s58_s30 = sshll.u32 %s3242_s29, 4  ;;  %s59_s30 = int_to_ptr.vmem [resolvable:$true] %s58_s30 }
  0x19   :  { %s3200_s12 = scalar_lea.vmem %s59_s30, 8192  ;;  %p3205_p11 = scmp.lt.s32.totalorder %s59_s30, %s59_s30 }
  0x1a   :  { %p3201_p10 = scmp.ne.s32.totalorder %s59_s30, %s3200_s12  ;;  %p3206_p12 = scmp.lt.s32.totalorder %s3200_s12, %s3200_s12 }
  0x1c   :  { %p3207_p13 = por %p3206_p12, %p3205_p11 }
  0x1e   :  { %p3208_p0 = pnand %p3207_p13, %p3201_p10 }
  0x20   :  { %3211 = shalt.err (!%p3208_p0)
}
  0x21   :  { %s3243_s5 = smov 512   ;;  %s3244_s13 = smov 32  }
  0x22   :  { %64 = dma.hbm_to_vmem [thread:$0]  %s3807_s7, 8192, %s59_s30, [#allocation6], %s3243_s5, %s3243_s5, %s3244_s13  }
  0x23   :  { %s3245_s16 = smov [#allocation8]  }
  0x24   :  { %s72_s17 = sshll.u32 %s3245_s16, 4  ;;  %s73_s17 = int_to_ptr.vmem [resolvable:$true] %s72_s17 }
  0x25   :  { %s3220_s3 = scalar_lea.vmem %s73_s17, 1024  ;;  %p3225_p2 = scmp.lt.s32.totalorder %s73_s17, %s73_s17 }
  0x26   :  { %p3221_p1 = scmp.ne.s32.totalorder %s73_s17, %s3220_s3  ;;  %p3226_p3 = scmp.lt.s32.totalorder %s3220_s3, %s3220_s3 }
  0x28   :  { %p3227_p4 = por %p3226_p3, %p3225_p2 }
  0x2a   :  { %p3228_p5 = pnand %p3227_p4, %p3221_p1 }
  0x2c   :  { %3231 = shalt.err (!%p3228_p5)
}
  0x2d   :  { %78 = dma.hbm_to_vmem [thread:$0]  %s3809_s9, 1024, %s73_s17, [#allocation9], %s3240_s22, %s3240_s22, %s3241_s23  }
  0x2e   :  { %3232 = dma.done.wait [#allocation4], 8192  }
  0x2f   :  { %3233 = vsyncadd [#allocation4], 4294959104 }
  0x30   :  { %3234 = dma.done.wait [#allocation6], 9216  }
  0x31   :  { %3235 = vsyncadd [#allocation6], 4294958080 }
  0x32   :  { %3236 = dma.done.wait [#allocation9], 1024  }
  0x33   :  { %3237 = vsyncadd [#allocation9], 4294966272  ;;  %v3246_v0 = vmov 0.0   ;;  %vm3247_vm0 = vmmov 0   ;;  %v3339_v1 = vld [vmem:[%s3801_s1 + $0x38] sm:$0xff]   ;;  %v3346_v2 = vld [vmem:[%s3801_s1 + $0x30] sm:$0xff]  }
  0x34   :  { %2711 = vmatprep.subr.bf16.mxu0 %v3246_v0  ;;  %2731 = vmatprep.subr.bf16.mxu1 %v3246_v0  ;;  %v3355_v3 = vld [vmem:[%s3801_s1 + $0x28] sm:$0xff]   ;;  %v3364_v4 = vld [vmem:[%s3801_s1 + $0x20] sm:$0xff]   ;;  %v3373_v5 = vld [vmem:[%s3801_s1 + $0x18] sm:$0xff]  }
  0x35   :  { %2727 = vmatprep.mubr.msk.bf16.mxu0 %vm3247_vm0, %v3246_v0  ;;  %2747 = vmatprep.mubr.msk.bf16.mxu1 %vm3247_vm0, %v3246_v0  ;;  %v3382_v6 = vld [vmem:[%s3801_s1 + $0x10] sm:$0xff]   ;;  %v3391_v7 = vld [vmem:[%s3801_s1 + $0x8] sm:$0xff]   ;;  %v3400_v8 = vld [vmem:[%s3801_s1] sm:$0xff]  }
  0x36   :  { %2712 = vmatpush3.bf16.msra.mxu0 %v3339_v1  ;;  %2732 = vmatpush3.bf16.msra.mxu1 %v3339_v1  ;;  %v111_v9 = vld [vmem:[%s3800_s0] sm:$0xf]  ;;  %v207_v10 = vld [vmem:[%s3800_s0 + $0x4] sm:$0xf]  ;;  %v249_v11 = vld [vmem:[%s3800_s0 + $0x8] sm:$0xf] }
  0x37   :  { %2713 = vmatprep.subr.bf16.mxu0 %v3246_v0  ;;  %2733 = vmatprep.subr.bf16.mxu1 %v3246_v0  ;;  %v291_v12 = vld [vmem:[%s3800_s0 + $0xc] sm:$0xf]  ;;  %v333_v13 = vld [vmem:[%s3800_s0 + $0x10] sm:$0xf]  ;;  %v375_v14 = vld [vmem:[%s3800_s0 + $0x14] sm:$0xf] }
  0x38   :  { %v3070_v15 = vld [vmem:[#allocation3 + $0x78] sm:$0xff]   ;;  %v3072_v21 = vld [vmem:[#allocation3 + $0x70] sm:$0xff]   ;;  %v3074_v25 = vld [vmem:[#allocation3 + $0x68] sm:$0xff]  }
  0x39   :  { %v3086_v16 = vld [vmem:[#allocation3 + $0xf8] sm:$0xff]   ;;  %v3088_v22 = vld [vmem:[#allocation3 + $0xf0] sm:$0xff]   ;;  %v3090_v26 = vld [vmem:[#allocation3 + $0xe8] sm:$0xff]  }
  0x3a   :  { %2714 = vmatpush3.bf16.msra.mxu0 %v3346_v2  ;;  %2734 = vmatpush3.bf16.msra.mxu1 %v3346_v2  ;;  %v417_v17 = vld [vmem:[%s3800_s0 + $0x18] sm:$0xf]  ;;  %v459_v18 = vld [vmem:[%s3800_s0 + $0x1c] sm:$0xf]  ;;  %v3073_v23 = vld [vmem:[#allocation3 + $0x30] sm:$0xff]  }
  0x3b   :  { %2715 = vmatprep.subr.bf16.mxu0 %v3246_v0  ;;  %2735 = vmatprep.subr.bf16.mxu1 %v3246_v0  ;;  %v3071_v19 = vld [vmem:[#allocation3 + $0x38] sm:$0xff]   ;;  %v3089_v24 = vld [vmem:[#allocation3 + $0xb0] sm:$0xff]   ;;  %v3075_v27 = vld [vmem:[#allocation3 + $0x28] sm:$0xff]  }
  0x3c   :  { %v3087_v20 = vld [vmem:[#allocation3 + $0xb8] sm:$0xff]   ;;  %v3091_v28 = vld [vmem:[#allocation3 + $0xa8] sm:$0xff]   ;;  %v3076_v29 = vld [vmem:[#allocation3 + $0x60] sm:$0xff]  }
  0x3d   :  { %v3092_v30 = vld [vmem:[#allocation3 + $0xe0] sm:$0xff]   ;;  %v3078_v33 = vld [vmem:[#allocation3 + $0x58] sm:$0xff]   ;;  %v3080_v37 = vld [vmem:[#allocation3 + $0x50] sm:$0xff]  }
  0x3e   :  { %2716 = vmatpush3.bf16.msra.mxu0 %v3355_v3  ;;  %2736 = vmatpush3.bf16.msra.mxu1 %v3355_v3  ;;  %v3077_v31 = vld [vmem:[#allocation3 + $0x20] sm:$0xff]   ;;  %v3094_v34 = vld [vmem:[#allocation3 + $0xd8] sm:$0xff]   ;;  %v3096_v38 = vld [vmem:[#allocation3 + $0xd0] sm:$0xff]  }
  0x3f   :  { %2717 = vmatprep.subr.bf16.mxu0 %v3246_v0  ;;  %2737 = vmatprep.subr.bf16.mxu1 %v3246_v0  ;;  %v3093_v32 = vld [vmem:[#allocation3 + $0xa0] sm:$0xff]   ;;  %v3079_v35 = vld [vmem:[#allocation3 + $0x18] sm:$0xff]   ;;  %v3081_v39 = vld [vmem:[#allocation3 + $0x10] sm:$0xff]  }
  0x40   :  { %v3095_v36 = vld [vmem:[#allocation3 + $0x98] sm:$0xff]   ;;  %v3097_v40 = vld [vmem:[#allocation3 + $0x90] sm:$0xff]   ;;  %v3082_v41 = vld [vmem:[#allocation3 + $0x48] sm:$0xff]  }
  0x41   :  { %v3098_v42 = vld [vmem:[#allocation3 + $0xc8] sm:$0xff]   ;;  %v3084_v45 = vld [vmem:[#allocation3 + $0x40] sm:$0xff]   ;;  %v3102_v49 = vld [vmem:[#allocation3 + $0x178] sm:$0xff]  }
  0x42   :  { %2718 = vmatpush3.bf16.msra.mxu0 %v3364_v4  ;;  %2738 = vmatpush3.bf16.msra.mxu1 %v3364_v4  ;;  %v3083_v43 = vld [vmem:[#allocation3 + $0x8] sm:$0xff]   ;;  %v3100_v46 = vld [vmem:[#allocation3 + $0xc0] sm:$0xff]   ;;  %v3118_v50 = vld [vmem:[#allocation3 + $0x1f8] sm:$0xff]  }
  0x43   :  { %2719 = vmatprep.subr.bf16.mxu0 %v3246_v0  ;;  %2739 = vmatprep.subr.bf16.mxu1 %v3246_v0  ;;  %v3099_v44 = vld [vmem:[#allocation3 + $0x88] sm:$0xff]   ;;  %v3085_v47 = vld [vmem:[#allocation3] sm:$0xff]   ;;  %v3103_v60 = vld [vmem:[#allocation3 + $0x138] sm:$0xff]  }
  0x44   :  { %v3101_v48 = vld [vmem:[#allocation3 + $0x80] sm:$0xff]   ;;  %v3104_v63 = vld [vmem:[#allocation3 + $0x170] sm:$0xff]  }
  0x45   :  { %v3541_v51 = vld [vmem:[%s3802_s2] ss:$0 sm:$0xff] }
  0x46   :  { %2720 = vmatpush3.bf16.msra.mxu0 %v3373_v5  ;;  %2740 = vmatpush3.bf16.msra.mxu1 %v3373_v5 }
  0x47   :  { %2721 = vmatprep.subr.bf16.mxu0 %v3246_v0  ;;  %2741 = vmatprep.subr.bf16.mxu1 %v3246_v0 }
  0x4a   :  { %2722 = vmatpush3.bf16.msra.mxu0 %v3382_v6  ;;  %2742 = vmatpush3.bf16.msra.mxu1 %v3382_v6 }
  0x4b   :  { %2723 = vmatprep.subr.bf16.mxu0 %v3246_v0  ;;  %2743 = vmatprep.subr.bf16.mxu1 %v3246_v0 }
  0x4e   :  { %2724 = vmatpush3.bf16.msra.mxu0 %v3391_v7  ;;  %2744 = vmatpush3.bf16.msra.mxu1 %v3391_v7 }
  0x4f   :  { %2725 = vmatprep.subr.bf16.mxu0 %v3246_v0  ;;  %2745 = vmatprep.subr.bf16.mxu1 %v3246_v0 }
  0x52   :  { %2726 = vmatpush3.bf16.msra.mxu0 %v3400_v8  ;;  %2746 = vmatpush3.bf16.msra.mxu1 %v3400_v8 }
  0x53   :  { %2751 = vmatprep.subr.bf16.mxu0 %v3246_v0  ;;  %2771 = vmatprep.subr.bf16.mxu1 %v3246_v0 }
  0x55   :  { %2728 = vmatmul.mubr.bf16.vlgmr.msra.gmra.mxu0 %v111_v9  ;;  %2748 = vmatmul.mubr.bf16.vlgmr.msra.gmra.mxu1 %v207_v10  ;;  %v3111_v9 = vld [vmem:[#allocation3 + $0x118] sm:$0xff]   ;;  %v3112_v10 = vld [vmem:[#allocation3 + $0x150] sm:$0xff]  }
  0x56   :  { %2752 = vmatpush3.bf16.msra.mxu0 %v3339_v1  ;;  %2772 = vmatpush3.bf16.msra.mxu1 %v3339_v1 }
  0x57   :  { %2753 = vmatprep.subr.bf16.mxu0 %v3246_v0  ;;  %2773 = vmatprep.subr.bf16.mxu1 %v3246_v0 }
  0x58   :  { %2767 = vmatprep.mubr.msk.bf16.mxu0 %vm3247_vm0, %v3246_v0  ;;  %2787 = vmatprep.mubr.msk.bf16.mxu1 %vm3247_vm0, %v3246_v0 }
  0x5a   :  { %2754 = vmatpush3.bf16.msra.mxu0 %v3346_v2  ;;  %2774 = vmatpush3.bf16.msra.mxu1 %v3346_v2 }
  0x5b   :  { %2755 = vmatprep.subr.bf16.mxu0 %v3246_v0  ;;  %2775 = vmatprep.subr.bf16.mxu1 %v3246_v0 }
  0x5e   :  { %2756 = vmatpush3.bf16.msra.mxu0 %v3355_v3  ;;  %2776 = vmatpush3.bf16.msra.mxu1 %v3355_v3 }
  0x5f   :  { %2757 = vmatprep.subr.bf16.mxu0 %v3246_v0  ;;  %2777 = vmatprep.subr.bf16.mxu1 %v3246_v0 }
  0x62   :  { %2758 = vmatpush3.bf16.msra.mxu0 %v3364_v4  ;;  %2778 = vmatpush3.bf16.msra.mxu1 %v3364_v4 }
  0x63   :  { %2759 = vmatprep.subr.bf16.mxu0 %v3246_v0  ;;  %2779 = vmatprep.subr.bf16.mxu1 %v3246_v0 }
  0x66   :  { %2760 = vmatpush3.bf16.msra.mxu0 %v3373_v5  ;;  %2780 = vmatpush3.bf16.msra.mxu1 %v3373_v5 }
  0x67   :  { %2761 = vmatprep.subr.bf16.mxu0 %v3246_v0  ;;  %2781 = vmatprep.subr.bf16.mxu1 %v3246_v0 }
  0x6a   :  { %2762 = vmatpush3.bf16.msra.mxu0 %v3382_v6  ;;  %2782 = vmatpush3.bf16.msra.mxu1 %v3382_v6 }
  0x6b   :  { %2763 = vmatprep.subr.bf16.mxu0 %v3246_v0  ;;  %2783 = vmatprep.subr.bf16.mxu1 %v3246_v0 }
  0x6e   :  { %2764 = vmatpush3.bf16.msra.mxu0 %v3391_v7  ;;  %2784 = vmatpush3.bf16.msra.mxu1 %v3391_v7 }
  0x6f   :  { %2765 = vmatprep.subr.bf16.mxu0 %v3246_v0  ;;  %2785 = vmatprep.subr.bf16.mxu1 %v3246_v0 }
  0x72   :  { %2766 = vmatpush3.bf16.msra.mxu0 %v3400_v8  ;;  %2786 = vmatpush3.bf16.msra.mxu1 %v3400_v8 }
  0x73   :  { %2791 = vmatprep.subr.bf16.mxu0 %v3246_v0  ;;  %2811 = vmatprep.subr.bf16.mxu1 %v3246_v0 }
  0x75   :  { %2768 = vmatmul.mubr.bf16.vlgmr.msra.gmra.mxu0 %v249_v11  ;;  %2788 = vmatmul.mubr.bf16.vlgmr.msra.gmra.mxu1 %v291_v12  ;;  %v3113_v11 = vld [vmem:[#allocation3 + $0x110] sm:$0xff]   ;;  %v3114_v12 = vld [vmem:[#allocation3 + $0x148] sm:$0xff]  }
  0x76   :  { %2792 = vmatpush3.bf16.msra.mxu0 %v3339_v1  ;;  %2812 = vmatpush3.bf16.msra.mxu1 %v3339_v1 }
  0x77   :  { %2793 = vmatprep.subr.bf16.mxu0 %v3246_v0  ;;  %2813 = vmatprep.subr.bf16.mxu1 %v3246_v0 }
  0x78   :  { %2807 = vmatprep.mubr.msk.bf16.mxu0 %vm3247_vm0, %v3246_v0  ;;  %2827 = vmatprep.mubr.msk.bf16.mxu1 %vm3247_vm0, %v3246_v0 }
  0x7a   :  { %2794 = vmatpush3.bf16.msra.mxu0 %v3346_v2  ;;  %2814 = vmatpush3.bf16.msra.mxu1 %v3346_v2 }
  0x7b   :  { %2795 = vmatprep.subr.bf16.mxu0 %v3246_v0  ;;  %2815 = vmatprep.subr.bf16.mxu1 %v3246_v0 }
  0x7e   :  { %2796 = vmatpush3.bf16.msra.mxu0 %v3355_v3  ;;  %2816 = vmatpush3.bf16.msra.mxu1 %v3355_v3 }
  0x7f   :  { %2797 = vmatprep.subr.bf16.mxu0 %v3246_v0  ;;  %2817 = vmatprep.subr.bf16.mxu1 %v3246_v0 }
  0x82   :  { %2798 = vmatpush3.bf16.msra.mxu0 %v3364_v4  ;;  %2818 = vmatpush3.bf16.msra.mxu1 %v3364_v4 }
  0x83   :  { %2799 = vmatprep.subr.bf16.mxu0 %v3246_v0  ;;  %2819 = vmatprep.subr.bf16.mxu1 %v3246_v0 }
  0x86   :  { %2800 = vmatpush3.bf16.msra.mxu0 %v3373_v5  ;;  %2820 = vmatpush3.bf16.msra.mxu1 %v3373_v5 }
  0x87   :  { %2801 = vmatprep.subr.bf16.mxu0 %v3246_v0  ;;  %2821 = vmatprep.subr.bf16.mxu1 %v3246_v0 }
  0x8a   :  { %2802 = vmatpush3.bf16.msra.mxu0 %v3382_v6  ;;  %2822 = vmatpush3.bf16.msra.mxu1 %v3382_v6 }
  0x8b   :  { %2803 = vmatprep.subr.bf16.mxu0 %v3246_v0  ;;  %2823 = vmatprep.subr.bf16.mxu1 %v3246_v0 }
  0x8e   :  { %2804 = vmatpush3.bf16.msra.mxu0 %v3391_v7  ;;  %2824 = vmatpush3.bf16.msra.mxu1 %v3391_v7 }
  0x8f   :  { %2805 = vmatprep.subr.bf16.mxu0 %v3246_v0  ;;  %2825 = vmatprep.subr.bf16.mxu1 %v3246_v0 }
  0x92   :  { %2806 = vmatpush3.bf16.msra.mxu0 %v3400_v8  ;;  %2826 = vmatpush3.bf16.msra.mxu1 %v3400_v8 }
  0x93   :  { %2831 = vmatprep.subr.bf16.mxu0 %v3246_v0  ;;  %2851 = vmatprep.subr.bf16.mxu1 %v3246_v0 }
  0x95   :  { %2808 = vmatmul.mubr.bf16.vlgmr.msra.gmra.mxu0 %v333_v13  ;;  %2828 = vmatmul.mubr.bf16.vlgmr.msra.gmra.mxu1 %v375_v14  ;;  %v3115_v13 = vld [vmem:[#allocation3 + $0x108] sm:$0xff]   ;;  %v3116_v14 = vld [vmem:[#allocation3 + $0x140] sm:$0xff]  }
  0x96   :  { %2832 = vmatpush3.bf16.msra.mxu0 %v3339_v1  ;;  %2852 = vmatpush3.bf16.msra.mxu1 %v3339_v1 }
  0x97   :  { %2833 = vmatprep.subr.bf16.mxu0 %v3246_v0  ;;  %2853 = vmatprep.subr.bf16.mxu1 %v3246_v0 }
  0x98   :  { %2847 = vmatprep.mubr.msk.bf16.mxu0 %vm3247_vm0, %v3246_v0  ;;  %2867 = vmatprep.mubr.msk.bf16.mxu1 %vm3247_vm0, %v3246_v0 }
  0x9a   :  { %2834 = vmatpush3.bf16.msra.mxu0 %v3346_v2  ;;  %2854 = vmatpush3.bf16.msra.mxu1 %v3346_v2 }
  0x9b   :  { %2835 = vmatprep.subr.bf16.mxu0 %v3246_v0  ;;  %2855 = vmatprep.subr.bf16.mxu1 %v3246_v0 }
  0x9e   :  { %2836 = vmatpush3.bf16.msra.mxu0 %v3355_v3  ;;  %2856 = vmatpush3.bf16.msra.mxu1 %v3355_v3  ;;  %v3105_v3 = vld [vmem:[#allocation3 + $0x130] sm:$0xff]  }
  0x9f   :  { %2837 = vmatprep.subr.bf16.mxu0 %v3246_v0  ;;  %2857 = vmatprep.subr.bf16.mxu1 %v3246_v0 }
  0xa2   :  { %2838 = vmatpush3.bf16.msra.mxu0 %v3364_v4  ;;  %2858 = vmatpush3.bf16.msra.mxu1 %v3364_v4  ;;  %v3106_v4 = vld [vmem:[#allocation3 + $0x168] sm:$0xff]  }
  0xa3   :  { %2839 = vmatprep.subr.bf16.mxu0 %v3246_v0  ;;  %2859 = vmatprep.subr.bf16.mxu1 %v3246_v0 }
  0xa6   :  { %2840 = vmatpush3.bf16.msra.mxu0 %v3373_v5  ;;  %2860 = vmatpush3.bf16.msra.mxu1 %v3373_v5  ;;  %v3107_v5 = vld [vmem:[#allocation3 + $0x128] sm:$0xff]  }
  0xa7   :  { %2841 = vmatprep.subr.bf16.mxu0 %v3246_v0  ;;  %2861 = vmatprep.subr.bf16.mxu1 %v3246_v0 }
  0xaa   :  { %2842 = vmatpush3.bf16.msra.mxu0 %v3382_v6  ;;  %2862 = vmatpush3.bf16.msra.mxu1 %v3382_v6  ;;  %v3108_v6 = vld [vmem:[#allocation3 + $0x160] sm:$0xff]  }
  0xab   :  { %2843 = vmatprep.subr.bf16.mxu0 %v3246_v0  ;;  %2863 = vmatprep.subr.bf16.mxu1 %v3246_v0 }
  0xae   :  { %2844 = vmatpush3.bf16.msra.mxu0 %v3391_v7  ;;  %2864 = vmatpush3.bf16.msra.mxu1 %v3391_v7  ;;  %v3109_v7 = vld [vmem:[#allocation3 + $0x120] sm:$0xff]  }
  0xaf   :  { %2845 = vmatprep.subr.bf16.mxu0 %v3246_v0  ;;  %2865 = vmatprep.subr.bf16.mxu1 %v3246_v0 }
  0xb2   :  { %2846 = vmatpush3.bf16.msra.mxu0 %v3400_v8  ;;  %2866 = vmatpush3.bf16.msra.mxu1 %v3400_v8  ;;  %v3110_v8 = vld [vmem:[#allocation3 + $0x158] sm:$0xff]  }
  0xb3   :  { %2542 = vmatprep.subr.bf16.mxu0 %v3070_v15  ;;  %2564 = vmatprep.subr.bf16.mxu1 %v3086_v16  ;;  %v3117_v15 = vld [vmem:[#allocation3 + $0x100] sm:$0xff]  }
  0xb5   :  { %2848 = vmatmul.mubr.bf16.vlgmr.msra.gmra.mxu0 %v417_v17  ;;  %2868 = vmatmul.mubr.bf16.vlgmr.msra.gmra.mxu1 %v459_v18 }
  0xb6   :  { %2543 = vmatpush3.bf16.msra.mxu0 %v3071_v19  ;;  %2565 = vmatpush3.bf16.msra.mxu1 %v3087_v20 }
  0xb7   :  { %2544 = vmatprep.subr.bf16.mxu0 %v3072_v21  ;;  %2566 = vmatprep.subr.bf16.mxu1 %v3088_v22 }
  0xba   :  { %2545 = vmatpush3.bf16.msra.mxu0 %v3073_v23  ;;  %2567 = vmatpush3.bf16.msra.mxu1 %v3089_v24  ;;  %v3119_v24 = vld [vmem:[#allocation3 + $0x1b8] sm:$0xff]  }
  0xbb   :  { %2546 = vmatprep.subr.bf16.mxu0 %v3074_v25  ;;  %2568 = vmatprep.subr.bf16.mxu1 %v3090_v26 }
  0xbe   :  { %2547 = vmatpush3.bf16.msra.mxu0 %v3075_v27  ;;  %2569 = vmatpush3.bf16.msra.mxu1 %v3091_v28  ;;  %v3120_v27 = vld [vmem:[#allocation3 + $0x1f0] sm:$0xff]  }
  0xbf   :  { %2548 = vmatprep.subr.bf16.mxu0 %v3076_v29  ;;  %2570 = vmatprep.subr.bf16.mxu1 %v3092_v30  ;;  %v3121_v30 = vld [vmem:[#allocation3 + $0x1b0] sm:$0xff]  }
  0xc2   :  { %2549 = vmatpush3.bf16.msra.mxu0 %v3077_v31  ;;  %2571 = vmatpush3.bf16.msra.mxu1 %v3093_v32  ;;  %v3122_v31 = vld [vmem:[#allocation3 + $0x1e8] sm:$0xff]  }
  0xc3   :  { %2550 = vmatprep.subr.bf16.mxu0 %v3078_v33  ;;  %2572 = vmatprep.subr.bf16.mxu1 %v3094_v34  ;;  %v3123_v32 = vld [vmem:[#allocation3 + $0x1a8] sm:$0xff]   ;;  %v3124_v33 = vld [vmem:[#allocation3 + $0x1e0] sm:$0xff]  }
  0xc4   :  { %v3125_v34 = vld [vmem:[#allocation3 + $0x1a0] sm:$0xff]  }
  0xc6   :  { %2551 = vmatpush3.bf16.msra.mxu0 %v3079_v35  ;;  %2573 = vmatpush3.bf16.msra.mxu1 %v3095_v36  ;;  %v3126_v35 = vld [vmem:[#allocation3 + $0x1d8] sm:$0xff]  }
  0xc7   :  { %2552 = vmatprep.subr.bf16.mxu0 %v3080_v37  ;;  %2574 = vmatprep.subr.bf16.mxu1 %v3096_v38  ;;  %v3127_v36 = vld [vmem:[#allocation3 + $0x198] sm:$0xff]   ;;  %v3128_v37 = vld [vmem:[#allocation3 + $0x1d0] sm:$0xff]  }
  0xc8   :  { %v3129_v38 = vld [vmem:[#allocation3 + $0x190] sm:$0xff]  }
  0xca   :  { %2553 = vmatpush3.bf16.msra.mxu0 %v3081_v39  ;;  %2575 = vmatpush3.bf16.msra.mxu1 %v3097_v40  ;;  %v3130_v39 = vld [vmem:[#allocation3 + $0x1c8] sm:$0xff]  }
  0xcb   :  { %2554 = vmatprep.subr.bf16.mxu0 %v3082_v41  ;;  %2576 = vmatprep.subr.bf16.mxu1 %v3098_v42  ;;  %v3131_v40 = vld [vmem:[#allocation3 + $0x188] sm:$0xff]   ;;  %v3132_v41 = vld [vmem:[#allocation3 + $0x1c0] sm:$0xff]  }
  0xcc   :  { %v3133_v42 = vld [vmem:[#allocation3 + $0x180] sm:$0xff]  }
  0xce   :  { %2555 = vmatpush3.bf16.msra.mxu0 %v3083_v43  ;;  %2577 = vmatpush3.bf16.msra.mxu1 %v3099_v44 }
  0xcf   :  { %2556 = vmatprep.subr.bf16.mxu0 %v3084_v45  ;;  %2578 = vmatprep.subr.bf16.mxu1 %v3100_v46 }
  0xd2   :  { %2557 = vmatpush3.bf16.msra.mxu0 %v3085_v47  ;;  %2579 = vmatpush3.bf16.msra.mxu1 %v3101_v48 }
  0xd3   :  { %2586 = vmatprep.subr.bf16.mxu0 %v3102_v49  ;;  %2608 = vmatprep.subr.bf16.mxu1 %v3118_v50 }
 0x115   :  { %v200_v52 = vpop.f32.mrf.mxu0  ;;  %v242_v53 = vpop.f32.mrf.mxu1 }
 0x116   :  { %v201_v54 = vadd.f32 %v3541_v51, %v200_v52  ;;  %v243_v55 = vadd.f32 %v3541_v51, %v242_v53 }
 0x117   :  { %v2729_v56 = vpop.f32.mrf.mxu0  ;;  %v2749_v57 = vpop.f32.mrf.mxu1 }
 0x118   :  { %v509_v58 = vpack.c.bf16 %v201_v54, %v201_v54  ;;  %v510_v59 = vpack.c.bf16 %v243_v55, %v243_v55 }
 0x119   :  { %v203_v61 = vpop.f32.mrf.mxu0  ;;  %v245_v62 = vpop.f32.mrf.mxu1 }
 0x11a   :  { %1068 = vmatprep.mubr.bf16.mxu0 %v510_v59 }
 0x11b   :  { %v2730_v1 = vpop.f32.mrf.mxu0  ;;  %v2750_v2 = vpop.f32.mrf.mxu1  ;;  %1069 = vmatmul.mubr.bf16.vlgmr.msra.gmra.mxu0 %v509_v58 }
 0x11c   :  { %2587 = vmatpush3.bf16.msra.mxu0 %v3103_v60 }
 0x11d   :  { %2588 = vmatprep.subr.bf16.mxu0 %v3104_v63 }
 0x120   :  { %2589 = vmatpush3.bf16.msra.mxu0 %v3105_v3 }
 0x121   :  { %2590 = vmatprep.subr.bf16.mxu0 %v3106_v4 }
 0x124   :  { %2591 = vmatpush3.bf16.msra.mxu0 %v3107_v5  ;;  %v3134_v5 = vld [vmem:[#allocation5 + $0x38] sm:$0xff]  }
 0x125   :  { %2592 = vmatprep.subr.bf16.mxu0 %v3108_v6  ;;  %v3135_v6 = vld [vmem:[#allocation5 + $0x30] sm:$0xff]  }
 0x128   :  { %2593 = vmatpush3.bf16.msra.mxu0 %v3109_v7  ;;  %v3136_v7 = vld [vmem:[#allocation5 + $0x28] sm:$0xff]  }
 0x129   :  { %2594 = vmatprep.subr.bf16.mxu0 %v3110_v8  ;;  %v3138_v8 = vld [vmem:[#allocation5 + $0x18] sm:$0xff]  }
 0x12c   :  { %2595 = vmatpush3.bf16.msra.mxu0 %v3111_v9  ;;  %v3139_v9 = vld [vmem:[#allocation5 + $0x10] sm:$0xff]  }
 0x12d   :  { %2596 = vmatprep.subr.bf16.mxu0 %v3112_v10  ;;  %v3140_v10 = vld [vmem:[#allocation5 + $0x8] sm:$0xff]  }
 0x130   :  { %2597 = vmatpush3.bf16.msra.mxu0 %v3113_v11  ;;  %v3141_v11 = vld [vmem:[#allocation5] sm:$0xff]  }
 0x131   :  { %2598 = vmatprep.subr.bf16.mxu0 %v3114_v12  ;;  %v1366_v12 = vld [vmem:[#allocation7 + $0x1c0] sm:$0xff] }
 0x134   :  { %2599 = vmatpush3.bf16.msra.mxu0 %v3115_v13  ;;  %v1370_v13 = vld [vmem:[#allocation7 + $0x1e0] sm:$0xff] }
 0x135   :  { %v284_v16 = vpop.f32.mrf.mxu0  ;;  %v326_v17 = vpop.f32.mrf.mxu1  ;;  %2600 = vmatprep.subr.bf16.mxu0 %v3116_v14  ;;  %v3561_v14 = vld [vmem:[#allocation7 + $0x1c8] sm:$0xff] }
 0x136   :  { %v285_v18 = vadd.f32 %v3541_v51, %v284_v16  ;;  %v327_v19 = vadd.f32 %v3541_v51, %v326_v17  ;;  %v2454_v16 = vcombine.high %v1366_v12, %v1370_v13  ;;  %v3563_v17 = vld [vmem:[#allocation7 + $0x1e8] sm:$0xff] }
 0x137   :  { %v2769_v20 = vpop.f32.mrf.mxu0  ;;  %v2789_v21 = vpop.f32.mrf.mxu1 }
 0x138   :  { %v511_v22 = vpack.c.bf16 %v285_v18, %v285_v18  ;;  %v512_v23 = vpack.c.bf16 %v327_v19, %v327_v19  ;;  %2601 = vmatpush3.bf16.msra.mxu0 %v3117_v15  ;;  %v2453_v15 = vcombine.low %v1366_v12, %v1370_v13  ;;  %v1358_v18 = vld [vmem:[#allocation7 + $0x180] sm:$0xff]  ;;  %v2455_v20 = vcombine.low %v3561_v14, %v3563_v17  ;;  %v1355_v12 = vld [vmem:[#allocation7 + $0x168] sm:$0xff] }
 0x139   :  { %v287_v25 = vpop.f32.mrf.mxu0  ;;  %v329_v26 = vpop.f32.mrf.mxu1  ;;  %2871 = vmatprep.subr.bf16.mxu0 %v3246_v0  ;;  %v1362_v19 = vld [vmem:[#allocation7 + $0x1a0] sm:$0xff]  ;;  %v2456_v21 = vcombine.high %v3561_v14, %v3563_v17 }
 0x13a   :  { %1108 = vmatprep.mubr.bf16.mxu1 %v512_v23  ;;  %v2445_v23 = vcombine.low %v1358_v18, %v1362_v19  ;;  %v1354_v25 = vld [vmem:[#allocation7 + $0x160] sm:$0xff] }
 0x13b   :  { %v2770_v28 = vpop.f32.mrf.mxu0  ;;  %v2790_v29 = vpop.f32.mrf.mxu1  ;;  %1109 = vmatmul.mubr.bf16.vlgmr.msra.gmra.mxu1 %v511_v22  ;;  %v2446_v22 = vcombine.high %v1358_v18, %v1362_v19  ;;  %v1347_v18 = vld [vmem:[#allocation7 + $0x128] sm:$0xff] }
 0x13c   :  { %2609 = vmatpush3.bf16.msra.mxu1 %v3119_v24  ;;  %v1350_v24 = vld [vmem:[#allocation7 + $0x140] sm:$0xff] }
 0x13d   :  { %2610 = vmatprep.subr.bf16.mxu1 %v3120_v27  ;;  %v2438_v26 = vcombine.high %v1350_v24, %v1354_v25  ;;  %v2437_v27 = vcombine.low %v1350_v24, %v1354_v25  ;;  %v1342_v29 = vld [vmem:[#allocation7 + $0x100] sm:$0xff] }
 0x140   :  { %2611 = vmatpush3.bf16.msra.mxu1 %v3121_v30  ;;  %v1346_v30 = vld [vmem:[#allocation7 + $0x120] sm:$0xff] }
 0x141   :  { %2612 = vmatprep.subr.bf16.mxu1 %v3122_v31  ;;  %v2430_v31 = vcombine.high %v1342_v29, %v1346_v30 }
 0x144   :  { %2613 = vmatpush3.bf16.msra.mxu1 %v3123_v32 }
 0x145   :  { %2614 = vmatprep.subr.bf16.mxu1 %v3124_v33 }
 0x148   :  { %2615 = vmatpush3.bf16.msra.mxu1 %v3125_v34  ;;  %v2429_v34 = vcombine.low %v1342_v29, %v1346_v30 }
 0x149   :  { %2616 = vmatprep.subr.bf16.mxu1 %v3126_v35 }
 0x14c   :  { %2617 = vmatpush3.bf16.msra.mxu1 %v3127_v36  ;;  %v1334_v36 = vld [vmem:[#allocation7 + $0xc0] sm:$0xff] }
 0x14d   :  { %2618 = vmatprep.subr.bf16.mxu1 %v3128_v37  ;;  %v1338_v37 = vld [vmem:[#allocation7 + $0xe0] sm:$0xff] }
 0x150   :  { %2619 = vmatpush3.bf16.msra.mxu1 %v3129_v38  ;;  %v2422_v38 = vcombine.high %v1334_v36, %v1338_v37 }
 0x151   :  { %2620 = vmatprep.subr.bf16.mxu1 %v3130_v39 }
 0x154   :  { %2621 = vmatpush3.bf16.msra.mxu1 %v3131_v40  ;;  %v2421_v40 = vcombine.low %v1334_v36, %v1338_v37  ;;  %v1315_v36 = vld [vmem:[#allocation7 + $0x28] sm:$0xff] }
 0x155   :  { %v368_v43 = vpop.f32.mrf.mxu0  ;;  %v410_v44 = vpop.f32.mrf.mxu1  ;;  %2622 = vmatprep.subr.bf16.mxu1 %v3132_v41  ;;  %v1326_v41 = vld [vmem:[#allocation7 + $0x80] sm:$0xff] }
 0x156   :  { %v369_v45 = vadd.f32 %v3541_v51, %v368_v43  ;;  %v411_v46 = vadd.f32 %v3541_v51, %v410_v44 }
 0x157   :  { %v2809_v47 = vpop.f32.mrf.mxu0  ;;  %v2829_v48 = vpop.f32.mrf.mxu1 }
 0x158   :  { %v513_v49 = vpack.c.bf16 %v369_v45, %v369_v45  ;;  %v514_v50 = vpack.c.bf16 %v411_v46, %v411_v46  ;;  %2623 = vmatpush3.bf16.msra.mxu1 %v3133_v42  ;;  %v1330_v42 = vld [vmem:[#allocation7 + $0xa0] sm:$0xff] }
 0x159   :  { %v371_v52 = vpop.f32.mrf.mxu0  ;;  %v413_v53 = vpop.f32.mrf.mxu1  ;;  %1736 = vmatprep.subr.bf16.mxu1 %v2454_v16  ;;  %v2414_v43 = vcombine.high %v1326_v41, %v1330_v42  ;;  %v2413_v44 = vcombine.low %v1326_v41, %v1330_v42  ;;  %v1318_v45 = vld [vmem:[#allocation7 + $0x40] sm:$0xff]  ;;  %v1343_v16 = vld [vmem:[#allocation7 + $0x108] sm:$0xff]  ;;  %v1372_v41 = vld [vmem:[#allocation7 + $0x1f0] sm:$0xff] }
 0x15a   :  { %1148 = vmatprep.mubr.bf16.mxu0 %v514_v50  ;;  %v1322_v46 = vld [vmem:[#allocation7 + $0x60] sm:$0xff]  ;;  %v2431_v24 = vcombine.low %v1343_v16, %v1347_v18  ;;  %v1369_v42 = vld [vmem:[#allocation7 + $0x1d8] sm:$0xff] }
 0x15b   :  { %v2810_v54 = vpop.f32.mrf.mxu0  ;;  %v2830_v55 = vpop.f32.mrf.mxu1  ;;  %1149 = vmatmul.mubr.bf16.vlgmr.msra.gmra.mxu0 %v513_v49  ;;  %v2406_v47 = vcombine.high %v1318_v45, %v1322_v46  ;;  %v2405_v48 = vcombine.low %v1318_v45, %v1322_v46 }
 0x15c   :  { %2887 = vmatprep.mubr.msk.bf16.mxu0 %vm3247_vm0, %v3246_v0  ;;  %2872 = vmatpush3.bf16.msra.mxu0 %v3134_v5 }
 0x15d   :  { %2873 = vmatprep.subr.bf16.mxu0 %v3246_v0 }
 0x160   :  { %2874 = vmatpush3.bf16.msra.mxu0 %v3135_v6 }
 0x161   :  { %2875 = vmatprep.subr.bf16.mxu0 %v3246_v0 }
 0x164   :  { %2876 = vmatpush3.bf16.msra.mxu0 %v3136_v7  ;;  %v1359_v7 = vld [vmem:[#allocation7 + $0x188] sm:$0xff] }
 0x165   :  { %2877 = vmatprep.subr.bf16.mxu0 %v3246_v0 }
 0x175   :  { %v452_v56 = vpop.f32.mrf.mxu0  ;;  %v494_v57 = vpop.f32.mrf.mxu1 }
 0x176   :  { %v453_v58 = vadd.f32 %v3541_v51, %v452_v56  ;;  %v495_v59 = vadd.f32 %v3541_v51, %v494_v57  ;;  %v3137_v51 = vld [vmem:[#allocation5 + $0x20] sm:$0xff]  }
 0x177   :  { %v2849_v60 = vpop.f32.mrf.mxu0  ;;  %v2869_v61 = vpop.f32.mrf.mxu1  ;;  %2878 = vmatpush3.bf16.msra.mxu0 %v3137_v51  ;;  %v1363_v51 = vld [vmem:[#allocation7 + $0x1a8] sm:$0xff] }
 0x178   :  { %v515_v62 = vpack.c.bf16 %v453_v58, %v453_v58  ;;  %v516_v63 = vpack.c.bf16 %v495_v59, %v495_v59  ;;  %2879 = vmatprep.subr.bf16.mxu0 %v3246_v0  ;;  %v2323_v58 = vld [vmem:[%s3804_s4] ss:$0 sm:$0xff]  ;;  %v2447_v13 = vcombine.low %v1359_v7, %v1363_v51 }
 0x179   :  { %v455_v1 = vpop.f32.mrf.mxu0  ;;  %v497_v2 = vpop.f32.mrf.mxu1 }
 0x17a   :  { %1188 = vmatprep.mubr.bf16.mxu1 %v516_v63 }
 0x17b   :  { %v2850_v3 = vpop.f32.mrf.mxu0  ;;  %v2870_v4 = vpop.f32.mrf.mxu1  ;;  %1189 = vmatmul.mubr.bf16.vlgmr.msra.gmra.mxu1 %v515_v62  ;;  %2880 = vmatpush3.bf16.msra.mxu0 %v3138_v8 }
 0x17c   :  { %2881 = vmatprep.subr.bf16.mxu0 %v3246_v0  ;;  %1737 = vmatpush1.bf16.msra.mxu1 %v2453_v15 }
 0x17d   :  { %1738 = vmatprep.subr.bf16.mxu1 %v2446_v22  ;;  %v1335_v22 = vld [vmem:[#allocation7 + $0xc8] sm:$0xff] }
 0x17f   :  { %2882 = vmatpush3.bf16.msra.mxu0 %v3139_v9 }
 0x180   :  { %2883 = vmatprep.subr.bf16.mxu0 %v3246_v0  ;;  %1739 = vmatpush1.bf16.msra.mxu1 %v2445_v23  ;;  %v1339_v23 = vld [vmem:[#allocation7 + $0xe8] sm:$0xff] }
 0x181   :  { %1740 = vmatprep.subr.bf16.mxu1 %v2438_v26  ;;  %v2424_v25 = vcombine.high %v1335_v22, %v1339_v23  ;;  %v1327_v26 = vld [vmem:[#allocation7 + $0x88] sm:$0xff]  ;;  %v2423_v14 = vcombine.low %v1335_v22, %v1339_v23 }
 0x183   :  { %2884 = vmatpush3.bf16.msra.mxu0 %v3140_v10  ;;  %v2448_v10 = vcombine.high %v1359_v7, %v1363_v51  ;;  %v1344_v51 = vld [vmem:[#allocation7 + $0x110] sm:$0xff] }
 0x184   :  { %2885 = vmatprep.subr.bf16.mxu0 %v3246_v0  ;;  %1741 = vmatpush1.bf16.msra.mxu1 %v2437_v27  ;;  %v1331_v27 = vld [vmem:[#allocation7 + $0xa8] sm:$0xff] }
 0x185   :  { %1742 = vmatprep.subr.bf16.mxu1 %v2430_v31  ;;  %v2416_v17 = vcombine.high %v1327_v26, %v1331_v27  ;;  %v2415_v29 = vcombine.low %v1327_v26, %v1331_v27  ;;  %v1328_v26 = vld [vmem:[#allocation7 + $0x90] sm:$0xff] }
 0x186   :  { %v1332_v27 = vld [vmem:[#allocation7 + $0xb0] sm:$0xff] }
 0x187   :  { %2886 = vmatpush3.bf16.msra.mxu0 %v3141_v11  ;;  %v1351_v11 = vld [vmem:[#allocation7 + $0x148] sm:$0xff] }
 0x188   :  { %1777 = vmatprep.subr.bf16.mxu0 %v2456_v21  ;;  %1743 = vmatpush1.bf16.msra.mxu1 %v2429_v34  ;;  %v2440_v15 = vcombine.high %v1351_v11, %v1355_v12  ;;  %v2439_v19 = vcombine.low %v1351_v11, %v1355_v12  ;;  %v2432_v21 = vcombine.high %v1343_v16, %v1347_v18  ;;  %v1311_v34 = vld [vmem:[#allocation7 + $0x8] sm:$0xff]  ;;  %v1336_v16 = vld [vmem:[#allocation7 + $0xd0] sm:$0xff] }
 0x189   :  { %1744 = vmatprep.subr.bf16.mxu1 %v2422_v38  ;;  %v2399_v38 = vcombine.low %v1311_v34, %v1315_v36  ;;  %v1340_v18 = vld [vmem:[#allocation7 + $0xf0] sm:$0xff] }
 0x18c   :  { %1745 = vmatpush1.bf16.msra.mxu1 %v2421_v40  ;;  %v1368_v40 = vld [vmem:[#allocation7 + $0x1d0] sm:$0xff] }
 0x18d   :  { %1746 = vmatprep.subr.bf16.mxu1 %v2414_v43  ;;  %v2458_v43 = vcombine.high %v1368_v40, %v1372_v41  ;;  %v2457_v45 = vcombine.low %v1368_v40, %v1372_v41  ;;  %v1316_v40 = vld [vmem:[#allocation7 + $0x30] sm:$0xff]  ;;  %v1313_v41 = vld [vmem:[#allocation7 + $0x18] sm:$0xff] }
 0x190   :  { %1747 = vmatpush1.bf16.msra.mxu1 %v2413_v44  ;;  %v1373_v44 = vld [vmem:[#allocation7 + $0x1f8] sm:$0xff] }
 0x191   :  { %1748 = vmatprep.subr.bf16.mxu1 %v2406_v47  ;;  %v2459_v46 = vcombine.low %v1369_v42, %v1373_v44  ;;  %v2460_v47 = vcombine.high %v1369_v42, %v1373_v44  ;;  %v1317_v42 = vld [vmem:[#allocation7 + $0x38] sm:$0xff] }
 0x194   :  { %1749 = vmatpush1.bf16.msra.mxu1 %v2405_v48  ;;  %v3248_v48 = vmov 0  }
 0x195   :  { %1768 = vmatprep.mubr.bf16.mxu1 %v3248_v48 }
 0x1db   :  { %v2558_v28 = vpop.f32.mrf.mxu0 }
 0x1dd   :  { %v2559_v32 = vpop.f32.mrf.mxu0 }
 0x1de   :  { %v2560_v33 = vadd.f32 %v2559_v32, %v2558_v28  ;;  %v1323_v28 = vld [vmem:[#allocation7 + $0x68] sm:$0xff]  ;;  %v1310_v32 = vld [vmem:[#allocation7] sm:$0xff] }
 0x1df   :  { %v2561_v35 = vpop.f32.mrf.mxu0 }
 0x1e0   :  { %v1071_v60 = vadd.f32 %v2560_v33, %v2323_v58  ;;  %v1314_v33 = vld [vmem:[#allocation7 + $0x20] sm:$0xff] }
 0x1e1   :  { %v2562_v39 = vpop.f32.mrf.mxu0  ;;  %v2398_v35 = vcombine.high %v1310_v32, %v1314_v33  ;;  %v2397_v37 = vcombine.low %v1310_v32, %v1314_v33  ;;  %v1324_v32 = vld [vmem:[#allocation7 + $0x70] sm:$0xff]  ;;  %v1321_v33 = vld [vmem:[#allocation7 + $0x58] sm:$0xff] }
 0x1e2   :  { %v2400_v39 = vcombine.high %v1311_v34, %v1315_v36  ;;  %v1325_v34 = vld [vmem:[#allocation7 + $0x78] sm:$0xff] }
 0x1e3   :  { %1750 = vmatprep.subr.bf16.mxu1 %v2398_v35  ;;  %v2417_v35 = vcombine.low %v1328_v26, %v1332_v27  ;;  %v2411_v44 = vcombine.low %v1321_v33, %v1325_v34 }
 0x1e4   :  { %1751 = vmatpush1.bf16.msra.mxu1 %v2397_v37 }
 0x1e5   :  { %1818 = vmatprep.subr.bf16.mxu1 %v2458_v43 }
 0x1fb   :  { %v2580_v49 = vpop.f32.mrf.mxu1 }
 0x1fd   :  { %v2581_v50 = vpop.f32.mrf.mxu1 }
 0x1fe   :  { %v2582_v59 = vadd.f32 %v2581_v50, %v2580_v49  ;;  %v2388_v49 = vld [vmem:[%s3806_s6] ss:$0 sm:$0xff]  ;;  %v1360_v50 = vld [vmem:[#allocation7 + $0x190] sm:$0xff] }
 0x1ff   :  { %v2583_v52 = vpop.f32.mrf.mxu1 }
 0x200   :  { %v1111_v63 = vadd.f32 %v2582_v59, %v1071_v60 }
 0x201   :  { %v2584_v53 = vpop.f32.mrf.mxu1 }
 0x202   :  { %v1364_v53 = vld [vmem:[#allocation7 + $0x1b0] sm:$0xff] }
 0x203   :  { %v2450_v59 = vcombine.high %v1360_v50, %v1364_v53 }
 0x21b   :  { %v2602_v54 = vpop.f32.mrf.mxu0 }
 0x21d   :  { %v2603_v55 = vpop.f32.mrf.mxu0 }
 0x21e   :  { %v2604_v61 = vadd.f32 %v2603_v55, %v2602_v54  ;;  %v1361_v54 = vld [vmem:[#allocation7 + $0x198] sm:$0xff] }
 0x21f   :  { %v2605_v56 = vpop.f32.mrf.mxu0  ;;  %v1365_v55 = vld [vmem:[#allocation7 + $0x1b8] sm:$0xff] }
 0x220   :  { %v1151_v2 = vadd.f32 %v2604_v61, %v1111_v63  ;;  %v2452_v60 = vcombine.high %v1361_v54, %v1365_v55  ;;  %v1352_v61 = vld [vmem:[#allocation7 + $0x150] sm:$0xff] }
 0x221   :  { %v2606_v57 = vpop.f32.mrf.mxu0  ;;  %v1356_v63 = vld [vmem:[#allocation7 + $0x170] sm:$0xff] }
 0x222   :  { %v2441_v11 = vcombine.low %v1352_v61, %v1356_v63 }
 0x23b   :  { %v2624_v62 = vpop.f32.mrf.mxu1 }
 0x23d   :  { %v2625_v1 = vpop.f32.mrf.mxu1 }
 0x23e   :  { %v2626_v3 = vadd.f32 %v2625_v1, %v2624_v62  ;;  %v1353_v1 = vld [vmem:[#allocation7 + $0x158] sm:$0xff] }
 0x23f   :  { %v2627_v4 = vpop.f32.mrf.mxu1 }
 0x240   :  { %v1191_v5 = vadd.f32 %v2626_v3, %v1151_v2  ;;  %v1357_v2 = vld [vmem:[#allocation7 + $0x178] sm:$0xff]  ;;  %v2449_v4 = vcombine.low %v1360_v50, %v1364_v53  ;;  %v3590_v50 = vld [vmem:[#allocation8 + $0x30] sm:$0xff]   ;;  %v3606_v53 = vld [vmem:[#allocation8 + $0x20] sm:$0xff]  }
 0x241   :  { %v2628_v6 = vpop.f32.mrf.mxu1  ;;  %v2444_v7 = vcombine.high %v1353_v1, %v1357_v2  ;;  %v2443_v12 = vcombine.low %v1353_v1, %v1357_v2 }
 0x242   :  { %3150 = vtanh.f32 %v1191_v5  ;;  %v2451_v5 = vcombine.low %v1361_v54, %v1365_v55  ;;  %v2442_v6 = vcombine.high %v1352_v61, %v1356_v63  ;;  %v3612_v54 = vld [vmem:[#allocation8 + $0x18] sm:$0xff]   ;;  %v3618_v55 = vld [vmem:[#allocation8 + $0x10] sm:$0xff]   ;;  %v3644_v61 = vld [vmem:[%s3808_s8] sm:$0xff] }
 0x24f   :  { %v3151_v8 = vpop.eup %3150 }
 0x250   :  { %v1197_v9 = vpack.c.bf16 %v3151_v8, %v3151_v8  ;;  %v1348_v8 = vld [vmem:[#allocation7 + $0x130] sm:$0xff] }
 0x251   :  { %v2433_v22 = vcombine.low %v1344_v51, %v1348_v8 }
 0x252   :  { %2888 = vmatmul.mubr.bf16.vlgmr.msra.gmra.mxu0 %v1197_v9  ;;  %v1345_v9 = vld [vmem:[#allocation7 + $0x118] sm:$0xff] }
 0x253   :  { %1778 = vmatpush1.bf16.msra.mxu0 %v2455_v20  ;;  %v1319_v20 = vld [vmem:[#allocation7 + $0x48] sm:$0xff]  ;;  %1809 = vmatprep.mubr.bf16.mxu0 %v3248_v48 }
 0x254   :  { %1779 = vmatprep.subr.bf16.mxu0 %v2448_v10  ;;  %v2408_v30 = vcombine.high %v1319_v20, %v1323_v28  ;;  %v2407_v31 = vcombine.low %v1319_v20, %v1323_v28  ;;  %v1349_v10 = vld [vmem:[#allocation7 + $0x138] sm:$0xff]  ;;  %v2425_v20 = vcombine.low %v1336_v16, %v1340_v18 }
 0x255   :  { %v2435_v23 = vcombine.low %v1345_v9, %v1349_v10 }
 0x257   :  { %1780 = vmatpush1.bf16.msra.mxu0 %v2447_v13  ;;  %v2434_v13 = vcombine.high %v1344_v51, %v1348_v8 }
 0x258   :  { %1781 = vmatprep.subr.bf16.mxu0 %v2440_v15  ;;  %v2436_v15 = vcombine.high %v1345_v9, %v1349_v10 }
 0x25b   :  { %1782 = vmatpush1.bf16.msra.mxu0 %v2439_v19  ;;  %v1337_v19 = vld [vmem:[#allocation7 + $0xd8] sm:$0xff] }
 0x25c   :  { %1783 = vmatprep.subr.bf16.mxu0 %v2432_v21  ;;  %v1341_v21 = vld [vmem:[#allocation7 + $0xf8] sm:$0xff] }
 0x25d   :  { %v2427_v28 = vcombine.low %v1337_v19, %v1341_v21 }
 0x25f   :  { %1784 = vmatpush1.bf16.msra.mxu0 %v2431_v24  ;;  %v2426_v24 = vcombine.high %v1336_v16, %v1340_v18 }
 0x260   :  { %1785 = vmatprep.subr.bf16.mxu0 %v2424_v25  ;;  %v2428_v25 = vcombine.high %v1337_v19, %v1341_v21 }
 0x263   :  { %1786 = vmatpush1.bf16.msra.mxu0 %v2423_v14  ;;  %v1329_v14 = vld [vmem:[#allocation7 + $0x98] sm:$0xff] }
 0x264   :  { %1787 = vmatprep.subr.bf16.mxu0 %v2416_v17  ;;  %v1333_v17 = vld [vmem:[#allocation7 + $0xb8] sm:$0xff] }
 0x265   :  { %v2419_v36 = vcombine.low %v1329_v14, %v1333_v17 }
 0x267   :  { %1788 = vmatpush1.bf16.msra.mxu0 %v2415_v29  ;;  %v2418_v29 = vcombine.high %v1328_v26, %v1332_v27 }
 0x268   :  { %1789 = vmatprep.subr.bf16.mxu0 %v2408_v30  ;;  %v2420_v30 = vcombine.high %v1329_v14, %v1333_v17 }
 0x26b   :  { %1790 = vmatpush1.bf16.msra.mxu0 %v2407_v31  ;;  %v1320_v31 = vld [vmem:[#allocation7 + $0x50] sm:$0xff] }
 0x26c   :  { %1791 = vmatprep.subr.bf16.mxu0 %v2400_v39  ;;  %v2410_v37 = vcombine.high %v1320_v31, %v1324_v32  ;;  %v1312_v39 = vld [vmem:[#allocation7 + $0x10] sm:$0xff]  ;;  %v2409_v43 = vcombine.low %v1320_v31, %v1324_v32 }
 0x26f   :  { %1792 = vmatpush1.bf16.msra.mxu0 %v2399_v38  ;;  %v2412_v38 = vcombine.high %v1321_v33, %v1325_v34 }
 0x270   :  { %1859 = vmatprep.subr.bf16.mxu0 %v2460_v47  ;;  %v2401_v47 = vcombine.low %v1312_v39, %v1316_v40 }
 0x312   :  { %v1303_v52 = vpop.f32.mrf.mxu0 }
 0x313   :  { %v1304_v56 = vadd.f32 %v2388_v49, %v1303_v52  ;;  %v3582_v49 = vld [vmem:[#allocation8 + $0x38] sm:$0xff]   ;;  %v3600_v52 = vld [vmem:[#allocation8 + $0x28] sm:$0xff]  }
 0x314   :  { %v2889_v57 = vpop.f32.mrf.mxu0 }
 0x315   :  { %v3578_v58 = vpack.c.bf16 %v1304_v56, %v1304_v56  ;;  %v3624_v56 = vld [vmem:[#allocation8 + $0x8] sm:$0xff]   ;;  %v3632_v57 = vld [vmem:[#allocation8] sm:$0xff]  }
 0x316   :  { %v1306_v62 = vpop.f32.mrf.mxu0 }
 0x317   :  { %1769 = vmatmul.mubr.bf16.vlgmr.msra.gmra.mxu1 %v3578_v58  ;;  %1810 = vmatmul.mubr.bf16.vlgmr.msra.gmra.mxu0 %v3578_v58 }
 0x318   :  { %1819 = vmatpush1.bf16.msra.mxu1 %v2457_v45  ;;  %1860 = vmatpush1.bf16.msra.mxu0 %v2459_v46  ;;  %v2890_v3 = vpop.f32.mrf.mxu0  ;;  %v2402_v45 = vcombine.high %v1312_v39, %v1316_v40  ;;  %v2404_v46 = vcombine.high %v1313_v41, %v1317_v42 }
 0x319   :  { %1820 = vmatprep.subr.bf16.mxu1 %v2450_v59  ;;  %1861 = vmatprep.subr.bf16.mxu0 %v2452_v60 }
 0x31a   :  { %1850 = vmatprep.mubr.bf16.mxu1 %v3248_v48  ;;  %1891 = vmatprep.mubr.bf16.mxu0 %v3248_v48  ;;  %v2403_v48 = vcombine.low %v1313_v41, %v1317_v42 }
 0x31c   :  { %1821 = vmatpush1.bf16.msra.mxu1 %v2449_v4  ;;  %1862 = vmatpush1.bf16.msra.mxu0 %v2451_v5 }
 0x31d   :  { %1822 = vmatprep.subr.bf16.mxu1 %v2442_v6  ;;  %1863 = vmatprep.subr.bf16.mxu0 %v2444_v7 }
 0x320   :  { %1823 = vmatpush1.bf16.msra.mxu1 %v2441_v11  ;;  %1864 = vmatpush1.bf16.msra.mxu0 %v2443_v12 }
 0x321   :  { %1824 = vmatprep.subr.bf16.mxu1 %v2434_v13  ;;  %1865 = vmatprep.subr.bf16.mxu0 %v2436_v15 }
 0x324   :  { %1825 = vmatpush1.bf16.msra.mxu1 %v2433_v22  ;;  %1866 = vmatpush1.bf16.msra.mxu0 %v2435_v23 }
 0x325   :  { %1826 = vmatprep.subr.bf16.mxu1 %v2426_v24  ;;  %1867 = vmatprep.subr.bf16.mxu0 %v2428_v25 }
 0x328   :  { %1827 = vmatpush1.bf16.msra.mxu1 %v2425_v20  ;;  %1868 = vmatpush1.bf16.msra.mxu0 %v2427_v28 }
 0x329   :  { %1828 = vmatprep.subr.bf16.mxu1 %v2418_v29  ;;  %1869 = vmatprep.subr.bf16.mxu0 %v2420_v30 }
 0x32c   :  { %1829 = vmatpush1.bf16.msra.mxu1 %v2417_v35  ;;  %1870 = vmatpush1.bf16.msra.mxu0 %v2419_v36 }
 0x32d   :  { %1830 = vmatprep.subr.bf16.mxu1 %v2410_v37  ;;  %1871 = vmatprep.subr.bf16.mxu0 %v2412_v38 }
 0x330   :  { %1831 = vmatpush1.bf16.msra.mxu1 %v2409_v43  ;;  %1872 = vmatpush1.bf16.msra.mxu0 %v2411_v44 }
 0x331   :  { %1832 = vmatprep.subr.bf16.mxu1 %v2402_v45  ;;  %1873 = vmatprep.subr.bf16.mxu0 %v2404_v46  ;;  %v2461_v45 = vld [vmem:[%s3810_s10] ss:$0 sm:$0xff] }
 0x334   :  { %1833 = vmatpush1.bf16.msra.mxu1 %v2401_v47  ;;  %1874 = vmatpush1.bf16.msra.mxu0 %v2403_v48 }
 0x335   :  { %2891 = vmatprep.subr.bf16.mxu1 %v3246_v0  ;;  %2911 = vmatprep.subr.bf16.mxu0 %v3246_v0 }
 0x337   :  { %1851 = vmatmul.mubr.bf16.vlgmr.msra.gmra.mxu1 %v3578_v58  ;;  %1892 = vmatmul.mubr.bf16.vlgmr.msra.gmra.mxu0 %v3578_v58  ;;  %v1376_v58 = vlaneseq }
 0x338   :  { %2892 = vmatpush3.bf16.msra.mxu1 %v3582_v49  ;;  %2912 = vmatpush3.bf16.msra.mxu0 %v3582_v49 }
 0x339   :  { %2893 = vmatprep.subr.bf16.mxu1 %v3246_v0  ;;  %2913 = vmatprep.subr.bf16.mxu0 %v3246_v0  ;;  %v3638_v59 = vshrl.u32 %v1376_v58, 7 }
 0x33a   :  { %2907 = vmatprep.mubr.msk.bf16.mxu1 %vm3247_vm0, %v3246_v0  ;;  %2927 = vmatprep.mubr.msk.bf16.mxu0 %vm3247_vm0, %v3246_v0 }
 0x33b   :  { %v1378_v60 = vsub.s32 0, %v3638_v59  ;;  %v1382_v62 = vsub.s32 1, %v3638_v59  ;;  %v1386_v13 = vsub.s32 2, %v3638_v59  ;;  %v1390_v15 = vsub.s32 3, %v3638_v59 }
 0x33c   :  { %2894 = vmatpush3.bf16.msra.mxu1 %v3590_v50  ;;  %2914 = vmatpush3.bf16.msra.mxu0 %v3590_v50  ;;  %v1394_v29 = vsub.s32 4, %v3638_v59  ;;  %v1398_v30 = vsub.s32 5, %v3638_v59  ;;  %v1402_v37 = vsub.s32 6, %v3638_v59  ;;  %v1406_v38 = vsub.s32 7, %v3638_v59 }
 0x33d   :  { %2895 = vmatprep.subr.bf16.mxu1 %v3246_v0  ;;  %2915 = vmatprep.subr.bf16.mxu0 %v3246_v0  ;;  %v1379_v63 = vrot.slane %v3644_v61, %v1378_v60  ;;  %v1383_v1 = vrot.slane %v3644_v61, %v1382_v62  ;;  %v1387_v16 = vrot.slane %v3644_v61, %v1386_v13 }
 0x33e   :  { %v1391_v18 = vrot.slane %v3644_v61, %v1390_v15  ;;  %v1395_v31 = vrot.slane %v3644_v61, %v1394_v29  ;;  %v1399_v32 = vrot.slane %v3644_v61, %v1398_v30  ;;  %v1403_v39 = vrot.slane %v3644_v61, %v1402_v37 }
 0x33f   :  { %v1407_v40 = vrot.slane %v3644_v61, %v1406_v38 }
 0x340   :  { %2896 = vmatpush3.bf16.msra.mxu1 %v3600_v52  ;;  %2916 = vmatpush3.bf16.msra.mxu0 %v3600_v52 }
 0x341   :  { %2897 = vmatprep.subr.bf16.mxu1 %v3246_v0  ;;  %2917 = vmatprep.subr.bf16.mxu0 %v3246_v0 }
 0x344   :  { %2898 = vmatpush3.bf16.msra.mxu1 %v3606_v53  ;;  %2918 = vmatpush3.bf16.msra.mxu0 %v3606_v53 }
 0x345   :  { %2899 = vmatprep.subr.bf16.mxu1 %v3246_v0  ;;  %2919 = vmatprep.subr.bf16.mxu0 %v3246_v0 }
 0x348   :  { %2900 = vmatpush3.bf16.msra.mxu1 %v3612_v54  ;;  %2920 = vmatpush3.bf16.msra.mxu0 %v3612_v54 }
 0x349   :  { %2901 = vmatprep.subr.bf16.mxu1 %v3246_v0  ;;  %2921 = vmatprep.subr.bf16.mxu0 %v3246_v0 }
 0x34c   :  { %2902 = vmatpush3.bf16.msra.mxu1 %v3618_v55  ;;  %2922 = vmatpush3.bf16.msra.mxu0 %v3618_v55 }
 0x34d   :  { %2903 = vmatprep.subr.bf16.mxu1 %v3246_v0  ;;  %2923 = vmatprep.subr.bf16.mxu0 %v3246_v0 }
 0x350   :  { %2904 = vmatpush3.bf16.msra.mxu1 %v3624_v56  ;;  %2924 = vmatpush3.bf16.msra.mxu0 %v3624_v56 }
 0x351   :  { %2905 = vmatprep.subr.bf16.mxu1 %v3246_v0  ;;  %2925 = vmatprep.subr.bf16.mxu0 %v3246_v0 }
 0x354   :  { %2906 = vmatpush3.bf16.msra.mxu1 %v3632_v57  ;;  %2926 = vmatpush3.bf16.msra.mxu0 %v3632_v57 }
 0x355   :  { %2931 = vmatprep.subr.bf16.mxu1 %v3246_v0  ;;  %2951 = vmatprep.subr.bf16.mxu0 %v3246_v0 }
 0x3d7   :  { %v1770_v2 = vpop.f32.mrf.mxu1  ;;  %v1811_v3 = vpop.f32.mrf.mxu0 }
 0x3d8   :  { %v1771_v4 = vadd.f32 %v1770_v2, %v1379_v63  ;;  %v1812_v19 = vadd.f32 %v1811_v3, %v1387_v16 }
 0x3d9   :  { %v1772_v5 = vpop.f32.mrf.mxu1  ;;  %v1813_v6 = vpop.f32.mrf.mxu0 }
 0x3da   :  { %v1900_v7 = vpack.c.bf16 %v1771_v4, %v1771_v4  ;;  %v1773_v51 = vadd.f32 %v1772_v5, %v1383_v1  ;;  %v1814_v23 = vadd.f32 %v1813_v6, %v1391_v18  ;;  %v1902_v26 = vpack.c.bf16 %v1812_v19, %v1812_v19 }
 0x3db   :  { %v1774_v8 = vpop.f32.mrf.mxu1  ;;  %v1815_v9 = vpop.f32.mrf.mxu0 }
 0x3dc   :  { %v1901_v10 = vpack.c.bf16 %v1773_v51, %v1773_v51  ;;  %2908 = vmatmul.mubr.bf16.vlgmr.msra.gmra.mxu1 %v1900_v7  ;;  %v1903_v17 = vpack.c.bf16 %v1814_v23, %v1814_v23 }
 0x3dd   :  { %2932 = vmatpush3.bf16.msra.mxu1 %v3582_v49  ;;  %v1775_v11 = vpop.f32.mrf.mxu1  ;;  %v1816_v12 = vpop.f32.mrf.mxu0  ;;  %2947 = vmatprep.mubr.msk.bf16.mxu1 %vm3247_vm0, %v3246_v0 }
 0x3de   :  { %2928 = vmatmul.mubr.bf16.vlgmr.msra.gmra.mxu0 %v1901_v10  ;;  %2933 = vmatprep.subr.bf16.mxu1 %v3246_v0 }
 0x3df   :  { %2952 = vmatpush3.bf16.msra.mxu0 %v3582_v49  ;;  %2967 = vmatprep.mubr.msk.bf16.mxu0 %vm3247_vm0, %v3246_v0 }
 0x3e0   :  { %2953 = vmatprep.subr.bf16.mxu0 %v3246_v0 }
 0x3e1   :  { %2934 = vmatpush3.bf16.msra.mxu1 %v3590_v50 }
 0x3e2   :  { %2935 = vmatprep.subr.bf16.mxu1 %v3246_v0 }
 0x3e3   :  { %2954 = vmatpush3.bf16.msra.mxu0 %v3590_v50 }
 0x3e4   :  { %2955 = vmatprep.subr.bf16.mxu0 %v3246_v0 }
 0x3e5   :  { %2936 = vmatpush3.bf16.msra.mxu1 %v3600_v52 }
 0x3e6   :  { %2937 = vmatprep.subr.bf16.mxu1 %v3246_v0 }
 0x3e7   :  { %2956 = vmatpush3.bf16.msra.mxu0 %v3600_v52 }
 0x3e8   :  { %2957 = vmatprep.subr.bf16.mxu0 %v3246_v0 }
 0x3e9   :  { %2938 = vmatpush3.bf16.msra.mxu1 %v3606_v53 }
 0x3ea   :  { %2939 = vmatprep.subr.bf16.mxu1 %v3246_v0 }
 0x3eb   :  { %2958 = vmatpush3.bf16.msra.mxu0 %v3606_v53 }
 0x3ec   :  { %2959 = vmatprep.subr.bf16.mxu0 %v3246_v0 }
 0x3ed   :  { %2940 = vmatpush3.bf16.msra.mxu1 %v3612_v54 }
 0x3ee   :  { %2941 = vmatprep.subr.bf16.mxu1 %v3246_v0 }
 0x3ef   :  { %2960 = vmatpush3.bf16.msra.mxu0 %v3612_v54 }
 0x3f0   :  { %2961 = vmatprep.subr.bf16.mxu0 %v3246_v0 }
 0x3f1   :  { %2942 = vmatpush3.bf16.msra.mxu1 %v3618_v55 }
 0x3f2   :  { %2943 = vmatprep.subr.bf16.mxu1 %v3246_v0 }
 0x3f3   :  { %2962 = vmatpush3.bf16.msra.mxu0 %v3618_v55 }
 0x3f4   :  { %2963 = vmatprep.subr.bf16.mxu0 %v3246_v0 }
 0x3f5   :  { %2944 = vmatpush3.bf16.msra.mxu1 %v3624_v56 }
 0x3f6   :  { %2945 = vmatprep.subr.bf16.mxu1 %v3246_v0 }
 0x3f7   :  { %v1852_v21 = vpop.f32.mrf.mxu1  ;;  %v3683_v22 = vpop.f32.mrf.mxu0  ;;  %2964 = vmatpush3.bf16.msra.mxu0 %v3624_v56 }
 0x3f8   :  { %2965 = vmatprep.subr.bf16.mxu0 %v3246_v0  ;;  %v1853_v33 = vadd.f32 %v1852_v21, %v1395_v31  ;;  %v1894_v41 = vadd.f32 %v3683_v22, %v1403_v39 }
 0x3f9   :  { %v1854_v24 = vpop.f32.mrf.mxu1  ;;  %v3687_v25 = vpop.f32.mrf.mxu0  ;;  %2946 = vmatpush3.bf16.msra.mxu1 %v3632_v57 }
 0x3fa   :  { %2971 = vmatprep.subr.bf16.mxu1 %v3246_v0  ;;  %v1855_v34 = vadd.f32 %v1854_v24, %v1399_v32  ;;  %v1904_v35 = vpack.c.bf16 %v1853_v33, %v1853_v33  ;;  %v1896_v42 = vadd.f32 %v3687_v25, %v1407_v40  ;;  %v1906_v43 = vpack.c.bf16 %v1894_v41, %v1894_v41 }
 0x3fb   :  { %v1856_v27 = vpop.f32.mrf.mxu1  ;;  %v1897_v14 = vpop.f32.mrf.mxu0  ;;  %2966 = vmatpush3.bf16.msra.mxu0 %v3632_v57 }
 0x3fc   :  { %2948 = vmatmul.mubr.bf16.vlgmr.msra.gmra.mxu1 %v1902_v26  ;;  %2991 = vmatprep.subr.bf16.mxu0 %v3246_v0  ;;  %v1905_v36 = vpack.c.bf16 %v1855_v34, %v1855_v34  ;;  %v1907_v44 = vpack.c.bf16 %v1896_v42, %v1896_v42 }
 0x3fd   :  { %v1857_v20 = vpop.f32.mrf.mxu1  ;;  %v1898_v28 = vpop.f32.mrf.mxu0  ;;  %2972 = vmatpush3.bf16.msra.mxu1 %v3582_v49  ;;  %2987 = vmatprep.mubr.msk.bf16.mxu1 %vm3247_vm0, %v3246_v0 }
 0x3fe   :  { %2968 = vmatmul.mubr.bf16.vlgmr.msra.gmra.mxu0 %v1903_v17  ;;  %2973 = vmatprep.subr.bf16.mxu1 %v3246_v0 }
 0x3ff   :  { %2992 = vmatpush3.bf16.msra.mxu0 %v3582_v49  ;;  %3007 = vmatprep.mubr.msk.bf16.mxu0 %vm3247_vm0, %v3246_v0 }
 0x400   :  { %2993 = vmatprep.subr.bf16.mxu0 %v3246_v0 }
 0x401   :  { %2974 = vmatpush3.bf16.msra.mxu1 %v3590_v50 }
 0x402   :  { %2975 = vmatprep.subr.bf16.mxu1 %v3246_v0 }
 0x403   :  { %2994 = vmatpush3.bf16.msra.mxu0 %v3590_v50 }
 0x404   :  { %2995 = vmatprep.subr.bf16.mxu0 %v3246_v0 }
 0x405   :  { %2976 = vmatpush3.bf16.msra.mxu1 %v3600_v52 }
 0x406   :  { %2977 = vmatprep.subr.bf16.mxu1 %v3246_v0 }
 0x407   :  { %2996 = vmatpush3.bf16.msra.mxu0 %v3600_v52 }
 0x408   :  { %2997 = vmatprep.subr.bf16.mxu0 %v3246_v0 }
 0x409   :  { %2978 = vmatpush3.bf16.msra.mxu1 %v3606_v53 }
 0x40a   :  { %2979 = vmatprep.subr.bf16.mxu1 %v3246_v0 }
 0x40b   :  { %2998 = vmatpush3.bf16.msra.mxu0 %v3606_v53 }
 0x40c   :  { %2999 = vmatprep.subr.bf16.mxu0 %v3246_v0 }
 0x40d   :  { %2980 = vmatpush3.bf16.msra.mxu1 %v3612_v54 }
 0x40e   :  { %2981 = vmatprep.subr.bf16.mxu1 %v3246_v0 }
 0x40f   :  { %3000 = vmatpush3.bf16.msra.mxu0 %v3612_v54 }
 0x410   :  { %3001 = vmatprep.subr.bf16.mxu0 %v3246_v0 }
 0x411   :  { %2982 = vmatpush3.bf16.msra.mxu1 %v3618_v55 }
 0x412   :  { %2983 = vmatprep.subr.bf16.mxu1 %v3246_v0 }
 0x413   :  { %3002 = vmatpush3.bf16.msra.mxu0 %v3618_v55 }
 0x414   :  { %3003 = vmatprep.subr.bf16.mxu0 %v3246_v0 }
 0x415   :  { %2984 = vmatpush3.bf16.msra.mxu1 %v3624_v56 }
 0x416   :  { %2985 = vmatprep.subr.bf16.mxu1 %v3246_v0 }
 0x417   :  { %3004 = vmatpush3.bf16.msra.mxu0 %v3624_v56 }
 0x418   :  { %3005 = vmatprep.subr.bf16.mxu0 %v3246_v0 }
 0x419   :  { %2986 = vmatpush3.bf16.msra.mxu1 %v3632_v57 }
 0x41a   :  { %3011 = vmatprep.subr.bf16.mxu1 %v3246_v0 }
 0x41b   :  { %3006 = vmatpush3.bf16.msra.mxu0 %v3632_v57 }
 0x41c   :  { %2988 = vmatmul.mubr.bf16.vlgmr.msra.gmra.mxu1 %v1904_v35  ;;  %3031 = vmatprep.subr.bf16.mxu0 %v3246_v0 }
 0x41d   :  { %3012 = vmatpush3.bf16.msra.mxu1 %v3582_v49  ;;  %3027 = vmatprep.mubr.msk.bf16.mxu1 %vm3247_vm0, %v3246_v0 }
 0x41e   :  { %3008 = vmatmul.mubr.bf16.vlgmr.msra.gmra.mxu0 %v1905_v36  ;;  %3013 = vmatprep.subr.bf16.mxu1 %v3246_v0 }
 0x41f   :  { %3032 = vmatpush3.bf16.msra.mxu0 %v3582_v49  ;;  %3047 = vmatprep.mubr.msk.bf16.mxu0 %vm3247_vm0, %v3246_v0 }
 0x420   :  { %3033 = vmatprep.subr.bf16.mxu0 %v3246_v0 }
 0x421   :  { %3014 = vmatpush3.bf16.msra.mxu1 %v3590_v50 }
 0x422   :  { %3015 = vmatprep.subr.bf16.mxu1 %v3246_v0 }
 0x423   :  { %3034 = vmatpush3.bf16.msra.mxu0 %v3590_v50 }
 0x424   :  { %3035 = vmatprep.subr.bf16.mxu0 %v3246_v0 }
 0x425   :  { %3016 = vmatpush3.bf16.msra.mxu1 %v3600_v52 }
 0x426   :  { %3017 = vmatprep.subr.bf16.mxu1 %v3246_v0 }
 0x427   :  { %3036 = vmatpush3.bf16.msra.mxu0 %v3600_v52 }
 0x428   :  { %3037 = vmatprep.subr.bf16.mxu0 %v3246_v0 }
 0x429   :  { %3018 = vmatpush3.bf16.msra.mxu1 %v3606_v53 }
 0x42a   :  { %3019 = vmatprep.subr.bf16.mxu1 %v3246_v0 }
 0x42b   :  { %3038 = vmatpush3.bf16.msra.mxu0 %v3606_v53 }
 0x42c   :  { %3039 = vmatprep.subr.bf16.mxu0 %v3246_v0 }
 0x42d   :  { %3020 = vmatpush3.bf16.msra.mxu1 %v3612_v54 }
 0x42e   :  { %3021 = vmatprep.subr.bf16.mxu1 %v3246_v0 }
 0x42f   :  { %3040 = vmatpush3.bf16.msra.mxu0 %v3612_v54 }
 0x430   :  { %3041 = vmatprep.subr.bf16.mxu0 %v3246_v0 }
 0x431   :  { %3022 = vmatpush3.bf16.msra.mxu1 %v3618_v55 }
 0x432   :  { %3023 = vmatprep.subr.bf16.mxu1 %v3246_v0 }
 0x433   :  { %3042 = vmatpush3.bf16.msra.mxu0 %v3618_v55 }
 0x434   :  { %3043 = vmatprep.subr.bf16.mxu0 %v3246_v0 }
 0x435   :  { %3024 = vmatpush3.bf16.msra.mxu1 %v3624_v56 }
 0x436   :  { %3025 = vmatprep.subr.bf16.mxu1 %v3246_v0 }
 0x437   :  { %3044 = vmatpush3.bf16.msra.mxu0 %v3624_v56 }
 0x438   :  { %3045 = vmatprep.subr.bf16.mxu0 %v3246_v0 }
 0x439   :  { %3026 = vmatpush3.bf16.msra.mxu1 %v3632_v57 }
 0x43b   :  { %3046 = vmatpush3.bf16.msra.mxu0 %v3632_v57 }
 0x43c   :  { %3028 = vmatmul.mubr.bf16.vlgmr.msra.gmra.mxu1 %v1906_v43 }
 0x43e   :  { %3048 = vmatmul.mubr.bf16.vlgmr.msra.gmra.mxu0 %v1907_v44 }
 0x49c   :  { %v2013_v46 = vpop.f32.mrf.mxu1 }
 0x49d   :  { %v2014_v47 = vadd.f32 %v2461_v45, %v2013_v46 }
 0x49e   :  { %v2909_v48 = vpop.f32.mrf.mxu1  ;;  %v2054_v49 = vpop.f32.mrf.mxu0 }
 0x49f   :  { %2019 = vst [vmem:[%s3811_s11] sm:$0xff] %v2014_v47  ;;  %v2055_v0 = vadd.f32 %v2461_v45, %v2054_v49 }
 0x4a0   :  { %v2016_v50 = vpop.f32.mrf.mxu1  ;;  %v2929_v52 = vpop.f32.mrf.mxu0 }
 0x4a1   :  { %2060 = vst [vmem:[%s3811_s11 + $0x8] sm:$0xff] %v2055_v0 }
 0x4a2   :  { %v2910_v53 = vpop.f32.mrf.mxu1  ;;  %v2057_v54 = vpop.f32.mrf.mxu0 }
 0x4a4   :  { %v2930_v55 = vpop.f32.mrf.mxu0 }
 0x4bc   :  { %v2095_v56 = vpop.f32.mrf.mxu1 }
 0x4bd   :  { %v2096_v57 = vadd.f32 %v2461_v45, %v2095_v56 }
 0x4be   :  { %v2949_v58 = vpop.f32.mrf.mxu1  ;;  %v2136_v59 = vpop.f32.mrf.mxu0 }
 0x4bf   :  { %2101 = vst [vmem:[%s3811_s11 + $0x10] sm:$0xff] %v2096_v57  ;;  %v2137_v60 = vadd.f32 %v2461_v45, %v2136_v59 }
 0x4c0   :  { %v2098_v61 = vpop.f32.mrf.mxu1  ;;  %v2969_v62 = vpop.f32.mrf.mxu0 }
 0x4c1   :  { %2142 = vst [vmem:[%s3811_s11 + $0x18] sm:$0xff] %v2137_v60 }
 0x4c2   :  { %v2950_v63 = vpop.f32.mrf.mxu1  ;;  %v2139_v1 = vpop.f32.mrf.mxu0 }
 0x4c4   :  { %v2970_v2 = vpop.f32.mrf.mxu0 }
 0x4dc   :  { %v2177_v3 = vpop.f32.mrf.mxu1 }
 0x4dd   :  { %v2178_v4 = vadd.f32 %v2461_v45, %v2177_v3 }
 0x4de   :  { %v2989_v5 = vpop.f32.mrf.mxu1  ;;  %v2218_v6 = vpop.f32.mrf.mxu0 }
 0x4df   :  { %2183 = vst [vmem:[%s3811_s11 + $0x20] sm:$0xff] %v2178_v4  ;;  %v2219_v7 = vadd.f32 %v2461_v45, %v2218_v6 }
 0x4e0   :  { %v2180_v51 = vpop.f32.mrf.mxu1  ;;  %v3009_v8 = vpop.f32.mrf.mxu0 }
 0x4e1   :  { %2224 = vst [vmem:[%s3811_s11 + $0x28] sm:$0xff] %v2219_v7 }
 0x4e2   :  { %v2990_v9 = vpop.f32.mrf.mxu1  ;;  %v2221_v10 = vpop.f32.mrf.mxu0 }
 0x4e4   :  { %v3010_v11 = vpop.f32.mrf.mxu0 }
 0x4fc   :  { %v2259_v12 = vpop.f32.mrf.mxu1 }
 0x4fd   :  { %v2260_v13 = vadd.f32 %v2461_v45, %v2259_v12 }
 0x4fe   :  { %v3029_v15 = vpop.f32.mrf.mxu1  ;;  %v2300_v16 = vpop.f32.mrf.mxu0 }
 0x4ff   :  { %2265 = vst [vmem:[%s3811_s11 + $0x30] sm:$0xff] %v2260_v13  ;;  %v2301_v18 = vadd.f32 %v2461_v45, %v2300_v16 }
 0x500   :  { %v2262_v19 = vpop.f32.mrf.mxu1  ;;  %v3049_v21 = vpop.f32.mrf.mxu0 }
 0x501   :  { %2306 = vst [vmem:[%s3811_s11 + $0x38] sm:$0xff] %v2301_v18 }
 0x502   :  { %v3030_v22 = vpop.f32.mrf.mxu1  ;;  %v2303_v23 = vpop.f32.mrf.mxu0 }
 0x504   :  { %v3050_v24 = vpop.f32.mrf.mxu0 }
 0x505   :  { %2311 = vsyncpa [#allocation4], 1 }
 0x506   :  { %2312 = vsyncpa [#allocation6], 1 }
 0x507   :  { %2313 = vsyncpa [#allocation9], 1 }

</bundles_post_ra>
